<compile_context>
chip_gen: v7x
topology: tpu7x:2x2x1
jax: 0.10.0
libtpu: 0.0.40
codegen_flags: <defaults>
</compile_context>

<pallas_src>
from functools import partial

import jax
import jax.numpy as jnp
from jax import lax
from jax.experimental import pallas as pl
from jax.experimental.pallas import tpu as pltpu

BN_EPS = 1e-5
MXU_DTYPE = jnp.bfloat16      # matmul operand dtype (f32 accumulation)
ACT_DTYPE = jnp.bfloat16      # HBM storage dtype for inter-conv activations
VMEM_LIMIT = 32 * 1024 * 1024


# ----------------------------- kernels --------------------------------------

def _im2col_matmul(band, w_ref, *, Hb, W, C):
    """3x3 / stride-1 conv of one padded band as a single im2col MXU matmul.

    band: (Hb+2, W+2, C) value in MXU_DTYPE whose halo ring is already the
    conv zero-padding. Returns the (Hb*W, C) f32 conv output for the band.
    """
    taps = [band[ky:ky + Hb, kx:kx + W, :].reshape(Hb * W, C)
            for ky in range(3) for kx in range(3)]
    patches = jnp.concatenate(taps, axis=-1)                   # (Hb*W, 9C)
    return jnp.dot(patches, w_ref[...], preferred_element_type=jnp.float32)


def _stats(h):
    # per-channel partial sum / sum-of-squares (f32) for the cross-band BN
    # reduction; accumulated in f32 regardless of the bf16 storage dtype.
    s = jnp.sum(h, axis=0, keepdims=True)
    ss = jnp.sum(h * h, axis=0, keepdims=True)
    return jnp.concatenate([s, ss], axis=0)                     # (2, C)


def _conv_stats_kernel(xb_ref, w_ref, h_ref, st_ref, *, Hb, W, C):
    # pass A: conv1 on one (band + halo) block, plus BN1 partial stats.
    h = _im2col_matmul(xb_ref[...], w_ref, Hb=Hb, W=W, C=C)
    h_ref[...] = h.astype(h_ref.dtype)
    st_ref[...] = _stats(h)


def _bn_act_conv_stats_kernel(hb_ref, sc_ref, bi_ref, al_ref, w_ref,
                              h_ref, st_ref, *, Hb, W, C):
    # pass B: BN1 affine + PReLU on the (band + halo) block (f32 math), then
    # re-zero the pad ring (conv2's zero-padding must remain exactly 0 after
    # the affine), then conv2 + BN2 partial stats.
    b = pl.program_id(1)
    nb = pl.num_programs(1)

    a = hb_ref[...].astype(jnp.float32) * sc_ref[...] + bi_ref[...]
    a = jnp.where(a > 0, a, al_ref[...] * a)                    # PReLU

    r = lax.broadcasted_iota(jnp.int32, (Hb + 2, W + 2, C), 0)
    c = lax.broadcasted_iota(jnp.int32, (Hb + 2, W + 2, C), 1)
    real = ((c >= 1) & (c <= W)
            & ((r >= 1) | (b > 0))          # top row is pad only for band 0
            & ((r <= Hb) | (b < nb - 1)))   # bottom row is pad only for last band
    a = jnp.where(real, a, 0.0)

    h = _im2col_matmul(a.astype(MXU_DTYPE), w_ref, Hb=Hb, W=W, C=C)
    h_ref[...] = h.astype(h_ref.dtype)
    st_ref[...] = _stats(h)


def _bn_residual_kernel(h2_ref, x_ref, sc_ref, bi_ref, o_ref):
    # pass C: BN2 affine + residual add (re-reads x per band instead of
    # keeping it live across the conv passes).
    h = h2_ref[...].astype(jnp.float32) * sc_ref[...] + bi_ref[...]
    o_ref[...] = (h + x_ref[...].astype(jnp.float32)).astype(o_ref.dtype)


# --------------------------- wrapper helpers ---------------------------------

def _pick_band_rows(H, requested):
    if requested is not None:
        if H % requested != 0:
            raise ValueError(f"band_rows={requested} must divide H={H}")
        return requested
    # Band height re-derived for v7x's 64 MiB VMEM: a 32-row band at SRGAN
    # scale (W=96, C=64) keeps (band + patches + outputs) x double-buffering
    # well under the scoped limit while amortizing per-step grid overhead.
    target = 32
    for hb in range(min(H, target), 0, -1):
        if H % hb == 0:
            return hb
    return H


def _pad_and_band(a_nhwc, Hb, dtype):
    """(N,H,W,C) -> (N, B, Hb+2, W+2, C): zero-padded, overlapping H-bands.

    The 1-pixel halo is materialized here so each grid point's input block is
    already the padded band (no in-kernel halo assembly / zero pass).
    # TODO(synk): replace with in-kernel double-buffered make_async_copy from
    # a padded HBM ref to drop the duplicated halo-row HBM traffic.
    """
    N, H, W, C = a_nhwc.shape
    B = H // Hb
    ap = jnp.pad(a_nhwc.astype(dtype), ((0, 0), (1, 1), (1, 1), (0, 0)))
    bands = [lax.slice_in_dim(ap, i * Hb, i * Hb + Hb + 2, axis=1)
             for i in range(B)]
    return jnp.stack(bands, axis=1)


def _bn_scale_bias(stats, count, gamma, beta):
    # Finalize training-mode BatchNorm2d from cross-band partial stats (f32).
    # Single-pass E[x^2]-E[x]^2 with a clamp against tiny negative variance.
    tot = jnp.sum(stats.astype(jnp.float32), axis=(0, 1))       # (2, C)
    mean = tot[0] / count
    var = jnp.maximum(tot[1] / count - mean * mean, 0.0)        # biased var
    scale = gamma.reshape(-1) * lax.rsqrt(var + BN_EPS)
    bias = beta.reshape(-1) - mean * scale
    return scale.reshape(1, -1), bias.reshape(1, -1)


def _compiler_params():
    return pltpu.CompilerParams(
        dimension_semantics=("parallel", "parallel"),
        vmem_limit_bytes=VMEM_LIMIT)


# --------------------------- pallas_call builders ----------------------------

def _call_conv_stats(xb, w, *, Hb, W, C):
    N, B = xb.shape[0], xb.shape[1]
    Mb = Hb * W
    kernel = partial(_conv_stats_kernel, Hb=Hb, W=W, C=C)
    cost = pl.CostEstimate(
        flops=2 * N * B * Mb * 9 * C * C, transcendentals=0,
        bytes_accessed=(xb.size * xb.dtype.itemsize
                        + w.size * w.dtype.itemsize
                        + N * B * Mb * C * jnp.dtype(ACT_DTYPE).itemsize
                        + N * B * 2 * C * 4))
    band_spec = pl.BlockSpec((None, None, Hb + 2, W + 2, C),
                             lambda n, b: (n, b, 0, 0, 0))
    w_spec = pl.BlockSpec((9 * C, C), lambda n, b: (0, 0))
    h_spec = pl.BlockSpec((None, None, Mb, C), lambda n, b: (n, b, 0, 0))
    st_spec = pl.BlockSpec((None, None, 2, C), lambda n, b: (n, b, 0, 0))
    return pl.pallas_call(
        kernel,
        grid=(N, B),
        in_specs=[band_spec, w_spec],
        out_specs=(h_spec, st_spec),
        out_shape=(jax.ShapeDtypeStruct((N, B, Mb, C), ACT_DTYPE),
                   jax.ShapeDtypeStruct((N, B, 2, C), jnp.float32)),
        compiler_params=_compiler_params(),
        cost_estimate=cost,
    )(xb, w)


def _call_bn_act_conv_stats(hb, scale, bias, alpha, w, *, Hb, W, C):
    N, B = hb.shape[0], hb.shape[1]
    Mb = Hb * W
    kernel = partial(_bn_act_conv_stats_kernel, Hb=Hb, W=W, C=C)
    cost = pl.CostEstimate(
        flops=2 * N * B * Mb * 9 * C * C + 6 * N * B * Mb * C, transcendentals=0,
        bytes_accessed=(hb.size * hb.dtype.itemsize
                        + w.size * w.dtype.itemsize
                        + N * B * Mb * C * jnp.dtype(ACT_DTYPE).itemsize
                        + N * B * 2 * C * 4 + 3 * C * 4))
    band_spec = pl.BlockSpec((None, None, Hb + 2, W + 2, C),
                             lambda n, b: (n, b, 0, 0, 0))
    vec_spec = pl.BlockSpec((1, C), lambda n, b: (0, 0))
    w_spec = pl.BlockSpec((9 * C, C), lambda n, b: (0, 0))
    h_spec = pl.BlockSpec((None, None, Mb, C), lambda n, b: (n, b, 0, 0))
    st_spec = pl.BlockSpec((None, None, 2, C), lambda n, b: (n, b, 0, 0))
    return pl.pallas_call(
        kernel,
        grid=(N, B),
        in_specs=[band_spec, vec_spec, vec_spec, vec_spec, w_spec],
        out_specs=(h_spec, st_spec),
        out_shape=(jax.ShapeDtypeStruct((N, B, Mb, C), ACT_DTYPE),
                   jax.ShapeDtypeStruct((N, B, 2, C), jnp.float32)),
        compiler_params=_compiler_params(),
        cost_estimate=cost,
    )(hb, scale, bias, alpha, w)


def _call_bn_residual(h2, x_r, scale, bias, out_dtype):
    N, B, Mb, C = h2.shape
    cost = pl.CostEstimate(
        flops=3 * N * B * Mb * C, transcendentals=0,
        bytes_accessed=(h2.size * h2.dtype.itemsize
                        + x_r.size * x_r.dtype.itemsize
                        + N * B * Mb * C * jnp.dtype(out_dtype).itemsize
                        + 2 * C * 4))
    blk = pl.BlockSpec((None, None, Mb, C), lambda n, b: (n, b, 0, 0))
    vec = pl.BlockSpec((1, C), lambda n, b: (0, 0))
    return pl.pallas_call(
        _bn_residual_kernel,
        grid=(N, B),
        in_specs=[blk, blk, vec, vec],
        out_specs=blk,
        out_shape=jax.ShapeDtypeStruct((N, B, Mb, C), out_dtype),
        compiler_params=_compiler_params(),
        cost_estimate=cost,
    )(h2, x_r, scale, bias)


# ------------------------------ entry points ---------------------------------

def residual_block_nhwc(x_nhwc, params, *, band_rows=None):
    """ResidualBlock forward in native NHWC.

    params: w1/w2 as (9C, C) im2col weights with (ky, kx, C_in) row order;
    g1/b1/a1/g2/b2 as (1, C).
    """
    N, H, W, C = x_nhwc.shape
    Hb = _pick_band_rows(H, band_rows)
    B = H // Hb
    Mb = Hb * W
    count = N * H * W

    w1 = params["w1"].astype(MXU_DTYPE)
    w2 = params["w2"].astype(MXU_DTYPE)
    g1, b1, a1, g2, b2 = (params[k].astype(jnp.float32)
                          for k in ("g1", "b1", "a1", "g2", "b2"))

    # ---- ConvLayer 1: gridded conv + cross-band BN stats ----
    xb = _pad_and_band(x_nhwc, Hb, MXU_DTYPE)
    h1, st1 = _call_conv_stats(xb, w1, Hb=Hb, W=W, C=C)
    scale1, bias1 = _bn_scale_bias(st1, count, g1, b1)

    # ---- ConvLayer 2: BN1 affine + PReLU fused into conv2's input band ----
    h1b = _pad_and_band(h1.reshape(N, H, W, C), Hb, ACT_DTYPE)
    h2, st2 = _call_bn_act_conv_stats(h1b, scale1, bias1, a1, w2,
                                      Hb=Hb, W=W, C=C)
    scale2, bias2 = _bn_scale_bias(st2, count, g2, b2)

    # ---- BN2 affine + residual add ----
    x_r = x_nhwc.reshape(N, B, Mb, C)          # free (row-major compatible)
    out = _call_bn_residual(h2, x_r, scale2, bias2, x_nhwc.dtype)
    return out.reshape(N, H, W, C)


def residual_block(x_nchw, params, *, band_rows=None):
    """NCHW adapter matching PyTorch's layout (test harness only — keep the
    real network NHWC end-to-end)."""
    x = jnp.transpose(x_nchw, (0, 2, 3, 1))
    out = residual_block_nhwc(x, params, band_rows=band_rows)
    return jnp.transpose(out, (0, 3, 1, 2))


# ------------------------------ references -----------------------------------

def _conv_nchw(x, w):
    return lax.conv_general_dilated(
        x, w, (1, 1), ((1, 1), (1, 1)),
        dimension_numbers=("NCHW", "OIHW", "NCHW"),
        precision=lax.Precision.HIGHEST)


def _reference_f32(x, w1, g1, b1, a1, w2, g2, b2):
    # exact PyTorch training-mode forward, full f32.
    def bn(h, g, bta):
        m = jnp.mean(h, axis=(0, 2, 3), keepdims=True)
        v = jnp.mean((h - m) ** 2, axis=(0, 2, 3), keepdims=True)
        return ((h - m) * lax.rsqrt(v + BN_EPS) * g.reshape(1, -1, 1, 1)
                + bta.reshape(1, -1, 1, 1))
    h = bn(_conv_nchw(x, w1), g1, b1)
    h = jnp.where(h > 0, h, a1.reshape(1, -1, 1, 1) * h)
    h = bn(_conv_nchw(h, w2), g2, b2)
    return h + x


def _reference_mixed(x, w1, g1, b1, a1, w2, g2, b2):
    # mirrors the kernel's mixed precision exactly: bf16 MXU operands + bf16
    # activation storage, f32 accumulation / stats / affine / residual.
    bf = lambda a: a.astype(jnp.bfloat16).astype(jnp.float32)

    def bn_affine(h, g, bta):
        m = jnp.mean(h, axis=(0, 2, 3), keepdims=True)
        v = jnp.maximum(jnp.mean(h * h, axis=(0, 2, 3), keepdims=True) - m * m, 0.0)
        sc = g.reshape(1, -1, 1, 1) * lax.rsqrt(v + BN_EPS)
        return sc, bta.reshape(1, -1, 1, 1) - m * sc

    h1 = _conv_nchw(bf(x), bf(w1))
    sc1, bi1 = bn_affine(h1, g1, b1)
    a = bf(h1) * sc1 + bi1
    a = jnp.where(a > 0, a, a1.reshape(1, -1, 1, 1) * a)
    h2 = _conv_nchw(bf(a), bf(w2))
    sc2, bi2 = bn_affine(h2, g2, b2)
    return bf(h2) * sc2 + bi2 + x


# --------------------------------- test ---------------------------------------

if __name__ == "__main__":
    N, C, H, W = 2, 4, 16, 16
    key = jax.random.PRNGKey(0)
    keys = jax.random.split(key, 8)

    x = jax.random.normal(keys[0], (N, C, H, W), jnp.float32)
    # PyTorch Conv2d weight layout: (C_out, C_in, kH, kW); no bias (use_bn=True)
    w1_pt = 0.1 * jax.random.normal(keys[1], (C, C, 3, 3), jnp.float32)
    w2_pt = 0.1 * jax.random.normal(keys[2], (C, C, 3, 3), jnp.float32)
    g1 = 1.0 + 0.1 * jax.random.normal(keys[3], (1, C), jnp.float32)
    b1 = 0.1 * jax.random.normal(keys[4], (1, C), jnp.float32)
    a1 = 0.25 + 0.05 * jax.random.normal(keys[5], (1, C), jnp.float32)
    g2 = 1.0 + 0.1 * jax.random.normal(keys[6], (1, C), jnp.float32)
    b2 = 0.1 * jax.random.normal(keys[7], (1, C), jnp.float32)

    def to_kernel_w(w_pt):
        # OIHW -> (kH, kW, C_in, C_out) -> (9*C_in, C_out): row order matches
        # the im2col tap order (ky, kx, C_in) used in the kernel.
        return jnp.transpose(w_pt, (2, 3, 1, 0)).reshape(9 * C, C)

    params = dict(w1=to_kernel_w(w1_pt), g1=g1, b1=b1, a1=a1,
                  w2=to_kernel_w(w2_pt), g2=g2, b2=b2)

    # band_rows=8 -> 2 H-bands per image: exercises the halo handling and the
    # cross-band BN-stats reduction at the toy shape.
    run = jax.jit(partial(residual_block, band_rows=8))
    out = jax.block_until_ready(run(x, params))
    assert out.shape == (N, C, H, W) and out.dtype == jnp.float32

    # Tight check vs a reference that mirrors the kernel's bf16-MXU / f32-acc
    # numerics (proves conv taps / halo / BN stats / PReLU / residual exact).
    ref_mixed = _reference_mixed(x, w1_pt, g1, b1, a1, w2_pt, g2, b2)
    err_m = jnp.max(jnp.abs(out - ref_mixed))
    assert jnp.allclose(out, ref_mixed, atol=2e-3, rtol=2e-3), \
        f"mixed-precision reference mismatch: max abs err {err_m}"

    # Coarse semantic check vs the exact f32 PyTorch forward (bf16 MXU
    # operands bound the deviation well below this tolerance).
    ref_f32 = _reference_f32(x, w1_pt, g1, b1, a1, w2_pt, g2, b2)
    err_f = jnp.max(jnp.abs(out - ref_f32))
    assert jnp.allclose(out, ref_f32, atol=1e-1, rtol=1e-1), \
        f"f32 reference mismatch: max abs err {err_f}"

    print("KERNEL_OK")
</pallas_src>

<mosaic_0001>
module attributes {stable_mosaic.version = 11 : i64} {
  func.func @_conv_stats_kernel(%arg0: i32, %arg1: i32, %arg2: memref<1x1x10x18x4xbf16, #tpu.memory_space<vmem>>, %arg3: memref<36x4xbf16, #tpu.memory_space<vmem>>, %arg4: memref<1x1x128x4xbf16, #tpu.memory_space<vmem>>, %arg5: memref<1x1x2x4xf32, #tpu.memory_space<vmem>>) attributes {dimension_semantics = [#tpu.dimension_semantics<parallel>, #tpu.dimension_semantics<parallel>], iteration_bounds = array<i64: 2, 2>, scalar_prefetch = 0 : i64, scratch_operands = 0 : i64, tpu.core_type = #tpu.core_type<tc>, window_params = [{transform_indices = @transform_0, window_bounds = array<i64: 1, 1, 10, 18, 4>}, {pipeline_mode = #tpu.pipeline_mode<synchronous>, transform_indices = @transform_1, window_bounds = array<i64: 36, 4>}, {transform_indices = @transform_2, window_bounds = array<i64: 1, 1, 128, 4>}, {transform_indices = @transform_3, window_bounds = array<i64: 1, 1, 2, 4>}]} {
    %c0 = arith.constant 0 : index
    %c0_0 = arith.constant 0 : index
    %c0_1 = arith.constant 0 : index
    %c0_2 = arith.constant 0 : index
    %c0_3 = arith.constant 0 : index
    %0 = vector.load %arg2[%c0, %c0_0, %c0_1, %c0_2, %c0_3] : memref<1x1x10x18x4xbf16, #tpu.memory_space<vmem>>, vector<1x1x10x18x4xbf16>
    %1 = vector.shape_cast %0 : vector<1x1x10x18x4xbf16> to vector<10x18x4xbf16>
    %2 = vector.extract_strided_slice %1 {offsets = [0, 0, 0], sizes = [8, 16, 4], strides = [1, 1, 1]} : vector<10x18x4xbf16> to vector<8x16x4xbf16>
    %3 = vector.shape_cast %2 : vector<8x16x4xbf16> to vector<128x4xbf16>
    %4 = vector.extract_strided_slice %1 {offsets = [0, 1, 0], sizes = [8, 16, 4], strides = [1, 1, 1]} : vector<10x18x4xbf16> to vector<8x16x4xbf16>
    %5 = vector.shape_cast %4 : vector<8x16x4xbf16> to vector<128x4xbf16>
    %6 = vector.extract_strided_slice %1 {offsets = [0, 2, 0], sizes = [8, 16, 4], strides = [1, 1, 1]} : vector<10x18x4xbf16> to vector<8x16x4xbf16>
    %7 = vector.shape_cast %6 : vector<8x16x4xbf16> to vector<128x4xbf16>
    %8 = vector.extract_strided_slice %1 {offsets = [1, 0, 0], sizes = [8, 16, 4], strides = [1, 1, 1]} : vector<10x18x4xbf16> to vector<8x16x4xbf16>
    %9 = vector.shape_cast %8 : vector<8x16x4xbf16> to vector<128x4xbf16>
    %10 = vector.extract_strided_slice %1 {offsets = [1, 1, 0], sizes = [8, 16, 4], strides = [1, 1, 1]} : vector<10x18x4xbf16> to vector<8x16x4xbf16>
    %11 = vector.shape_cast %10 : vector<8x16x4xbf16> to vector<128x4xbf16>
    %12 = vector.extract_strided_slice %1 {offsets = [1, 2, 0], sizes = [8, 16, 4], strides = [1, 1, 1]} : vector<10x18x4xbf16> to vector<8x16x4xbf16>
    %13 = vector.shape_cast %12 : vector<8x16x4xbf16> to vector<128x4xbf16>
    %14 = vector.extract_strided_slice %1 {offsets = [2, 0, 0], sizes = [8, 16, 4], strides = [1, 1, 1]} : vector<10x18x4xbf16> to vector<8x16x4xbf16>
    %15 = vector.shape_cast %14 : vector<8x16x4xbf16> to vector<128x4xbf16>
    %16 = vector.extract_strided_slice %1 {offsets = [2, 1, 0], sizes = [8, 16, 4], strides = [1, 1, 1]} : vector<10x18x4xbf16> to vector<8x16x4xbf16>
    %17 = vector.shape_cast %16 : vector<8x16x4xbf16> to vector<128x4xbf16>
    %18 = vector.extract_strided_slice %1 {offsets = [2, 2, 0], sizes = [8, 16, 4], strides = [1, 1, 1]} : vector<10x18x4xbf16> to vector<8x16x4xbf16>
    %19 = vector.shape_cast %18 : vector<8x16x4xbf16> to vector<128x4xbf16>
    %20 = tpu.concatenate %3, %5, %7, %9, %11, %13, %15, %17, %19 in 1 : vector<128x4xbf16>, vector<128x4xbf16>, vector<128x4xbf16>, vector<128x4xbf16>, vector<128x4xbf16>, vector<128x4xbf16>, vector<128x4xbf16>, vector<128x4xbf16>, vector<128x4xbf16> -> vector<128x36xbf16>
    %c0_4 = arith.constant 0 : index
    %c0_5 = arith.constant 0 : index
    %21 = vector.load %arg3[%c0_4, %c0_5] : memref<36x4xbf16, #tpu.memory_space<vmem>>, vector<36x4xbf16>
    %cst = arith.constant dense<0.000000e+00> : vector<128x4xf32>
    %22 = tpu.matmul %20, %21, %cst {dimension_numbers = #tpu.dot_dimension_numbers<[1], [0], [0], [1], [0, 0, 1, 1], [], []>} : vector<128x36xbf16>, vector<36x4xbf16>, vector<128x4xf32> -> vector<128x4xf32>
    %23 = arith.truncf %22 : vector<128x4xf32> to vector<128x4xbf16>
    %c0_6 = arith.constant 0 : index
    %c0_7 = arith.constant 0 : index
    %c0_8 = arith.constant 0 : index
    %c0_9 = arith.constant 0 : index
    %24 = vector.load %arg4[%c0_6, %c0_7, %c0_8, %c0_9] : memref<1x1x128x4xbf16, #tpu.memory_space<vmem>>, vector<1x1x128x4xbf16>
    %25 = vector.shape_cast %24 : vector<1x1x128x4xbf16> to vector<128x4xbf16>
    %26 = vector.shape_cast %23 : vector<128x4xbf16> to vector<1x1x128x4xbf16>
    tpu.vector_store %arg4[%c0_6, %c0_7, %c0_8, %c0_9], %26 {strides = array<i32>} : memref<1x1x128x4xbf16, #tpu.memory_space<vmem>>, vector<1x1x128x4xbf16>,
    %cst_10 = arith.constant dense<0.000000e+00> : vector<4xf32>
    %27 = vector.multi_reduction <add>, %22, %cst_10 [0] : vector<128x4xf32> to vector<4xf32>
    %28 = vector.shape_cast %27 : vector<4xf32> to vector<1x4xf32>
    %29 = arith.mulf %22, %22 : vector<128x4xf32>
    %cst_11 = arith.constant dense<0.000000e+00> : vector<4xf32>
    %30 = vector.multi_reduction <add>, %29, %cst_11 [0] : vector<128x4xf32> to vector<4xf32>
    %31 = vector.shape_cast %30 : vector<4xf32> to vector<1x4xf32>
    %32 = tpu.concatenate %28, %31 in 0 : vector<1x4xf32>, vector<1x4xf32> -> vector<2x4xf32>
    %c0_12 = arith.constant 0 : index
    %c0_13 = arith.constant 0 : index
    %c0_14 = arith.constant 0 : index
    %c0_15 = arith.constant 0 : index
    %33 = vector.load %arg5[%c0_12, %c0_13, %c0_14, %c0_15] : memref<1x1x2x4xf32, #tpu.memory_space<vmem>>, vector<1x1x2x4xf32>
    %34 = vector.shape_cast %33 : vector<1x1x2x4xf32> to vector<2x4xf32>
    %35 = vector.shape_cast %32 : vector<2x4xf32> to vector<1x1x2x4xf32>
    tpu.vector_store %arg5[%c0_12, %c0_13, %c0_14, %c0_15], %35 {strides = array<i32>} : memref<1x1x2x4xf32, #tpu.memory_space<vmem>>, vector<1x1x2x4xf32>,
    return
  }
  func.func @transform_0(%arg0: i32, %arg1: i32) -> (i32, i32, i32, i32, i32) {
    %c0_i32 = arith.constant 0 : i32
    %c0_i32_0 = arith.constant 0 : i32
    %c0_i32_1 = arith.constant 0 : i32
    %c0_i32_2 = arith.constant 0 : i32
    return %arg0, %arg1, %c0_i32, %c0_i32_0, %c0_i32_1 : i32, i32, i32, i32, i32
  }
  func.func @transform_1(%arg0: i32, %arg1: i32) -> (i32, i32) {
    %c0_i32 = arith.constant 0 : i32
    %c0_i32_0 = arith.constant 0 : i32
    %c0_i32_1 = arith.constant 0 : i32
    return %c0_i32, %c0_i32_0 : i32, i32
  }
  func.func @transform_2(%arg0: i32, %arg1: i32) -> (i32, i32, i32, i32) {
    %c0_i32 = arith.constant 0 : i32
    %c0_i32_0 = arith.constant 0 : i32
    %c0_i32_1 = arith.constant 0 : i32
    return %arg0, %arg1, %c0_i32, %c0_i32_0 : i32, i32, i32, i32
  }
  func.func @transform_3(%arg0: i32, %arg1: i32) -> (i32, i32, i32, i32) {
    %c0_i32 = arith.constant 0 : i32
    %c0_i32_0 = arith.constant 0 : i32
    %c0_i32_1 = arith.constant 0 : i32
    return %arg0, %arg1, %c0_i32, %c0_i32_0 : i32, i32, i32, i32
  }
}

module attributes {stable_mosaic.version = 11 : i64} {
  func.func @_bn_act_conv_stats_kernel(%arg0: i32, %arg1: i32, %arg2: memref<1x1x10x18x4xbf16, #tpu.memory_space<vmem>>, %arg3: memref<1x4xf32, #tpu.memory_space<vmem>>, %arg4: memref<1x4xf32, #tpu.memory_space<vmem>>, %arg5: memref<1x4xf32, #tpu.memory_space<vmem>>, %arg6: memref<36x4xbf16, #tpu.memory_space<vmem>>, %arg7: memref<1x1x128x4xbf16, #tpu.memory_space<vmem>>, %arg8: memref<1x1x2x4xf32, #tpu.memory_space<vmem>>) attributes {dimension_semantics = [#tpu.dimension_semantics<parallel>, #tpu.dimension_semantics<parallel>], iteration_bounds = array<i64: 2, 2>, scalar_prefetch = 0 : i64, scratch_operands = 0 : i64, tpu.core_type = #tpu.core_type<tc>, window_params = [{transform_indices = @transform_0, window_bounds = array<i64: 1, 1, 10, 18, 4>}, {pipeline_mode = #tpu.pipeline_mode<synchronous>, transform_indices = @transform_1, window_bounds = array<i64: 1, 4>}, {pipeline_mode = #tpu.pipeline_mode<synchronous>, transform_indices = @transform_2, window_bounds = array<i64: 1, 4>}, {pipeline_mode = #tpu.pipeline_mode<synchronous>, transform_indices = @transform_3, window_bounds = array<i64: 1, 4>}, {pipeline_mode = #tpu.pipeline_mode<synchronous>, transform_indices = @transform_4, window_bounds = array<i64: 36, 4>}, {transform_indices = @transform_5, window_bounds = array<i64: 1, 1, 128, 4>}, {transform_indices = @transform_6, window_bounds = array<i64: 1, 1, 2, 4>}]} {
    %c0 = arith.constant 0 : index
    %c0_0 = arith.constant 0 : index
    %c0_1 = arith.constant 0 : index
    %c0_2 = arith.constant 0 : index
    %c0_3 = arith.constant 0 : index
    %0 = vector.load %arg2[%c0, %c0_0, %c0_1, %c0_2, %c0_3] : memref<1x1x10x18x4xbf16, #tpu.memory_space<vmem>>, vector<1x1x10x18x4xbf16>
    %1 = vector.shape_cast %0 : vector<1x1x10x18x4xbf16> to vector<10x18x4xbf16>
    %2 = arith.extf %1 : vector<10x18x4xbf16> to vector<10x18x4xf32>
    %c0_4 = arith.constant 0 : index
    %c0_5 = arith.constant 0 : index
    %3 = vector.load %arg3[%c0_4, %c0_5] : memref<1x4xf32, #tpu.memory_space<vmem>>, vector<1x4xf32>
    %4 = vector.shape_cast %3 : vector<1x4xf32> to vector<1x1x4xf32>
    %5 = vector.broadcast %4 : vector<1x1x4xf32> to vector<10x18x4xf32>
    %6 = arith.mulf %2, %5 : vector<10x18x4xf32>
    %c0_6 = arith.constant 0 : index
    %c0_7 = arith.constant 0 : index
    %7 = vector.load %arg4[%c0_6, %c0_7] : memref<1x4xf32, #tpu.memory_space<vmem>>, vector<1x4xf32>
    %8 = vector.shape_cast %7 : vector<1x4xf32> to vector<1x1x4xf32>
    %9 = vector.broadcast %8 : vector<1x1x4xf32> to vector<10x18x4xf32>
    %10 = arith.addf %6, %9 : vector<10x18x4xf32>
    %cst = arith.constant 0.000000e+00 : f32
    %11 = vector.broadcast %cst : f32 to vector<10x18x4xf32>
    %12 = arith.cmpf ogt, %10, %11 : vector<10x18x4xf32>
    %c0_8 = arith.constant 0 : index
    %c0_9 = arith.constant 0 : index
    %13 = vector.load %arg5[%c0_8, %c0_9] : memref<1x4xf32, #tpu.memory_space<vmem>>, vector<1x4xf32>
    %14 = vector.shape_cast %13 : vector<1x4xf32> to vector<1x1x4xf32>
    %15 = vector.broadcast %14 : vector<1x1x4xf32> to vector<10x18x4xf32>
    %16 = arith.mulf %15, %10 : vector<10x18x4xf32>
    %17 = arith.select %12, %10, %16 : vector<10x18x4xi1>, vector<10x18x4xf32>
    %18 = tpu.iota {dimensions = array<i32: 0>} : vector<10x18x4xi32>
    %19 = tpu.iota {dimensions = array<i32: 1>} : vector<10x18x4xi32>
    %c1_i32 = arith.constant 1 : i32
    %20 = vector.broadcast %c1_i32 : i32 to vector<10x18x4xi32>
    %21 = arith.cmpi sge, %19, %20 : vector<10x18x4xi32>
    %c16_i32 = arith.constant 16 : i32
    %22 = vector.broadcast %c16_i32 : i32 to vector<10x18x4xi32>
    %23 = arith.cmpi sle, %19, %22 : vector<10x18x4xi32>
    %24 = arith.andi %21, %23 : vector<10x18x4xi1>
    %c1_i32_10 = arith.constant 1 : i32
    %25 = vector.broadcast %c1_i32_10 : i32 to vector<10x18x4xi32>
    %26 = arith.cmpi sge, %18, %25 : vector<10x18x4xi32>
    %c0_i32 = arith.constant 0 : i32
    %27 = arith.cmpi sgt, %arg1, %c0_i32 : i32
    %28 = vector.broadcast %27 : i1 to vector<10x18x4xi1>
    %29 = arith.ori %26, %28 : vector<10x18x4xi1>
    %30 = arith.andi %24, %29 : vector<10x18x4xi1>
    %c8_i32 = arith.constant 8 : i32
    %31 = vector.broadcast %c8_i32 : i32 to vector<10x18x4xi32>
    %32 = arith.cmpi sle, %18, %31 : vector<10x18x4xi32>
    %c1_i32_11 = arith.constant 1 : i32
    %33 = arith.cmpi slt, %arg1, %c1_i32_11 : i32
    %34 = vector.broadcast %33 : i1 to vector<10x18x4xi1>
    %35 = arith.ori %32, %34 : vector<10x18x4xi1>
    %36 = arith.andi %30, %35 : vector<10x18x4xi1>
    %cst_12 = arith.constant 0.000000e+00 : f32
    %37 = vector.broadcast %cst_12 : f32 to vector<10x18x4xf32>
    %38 = arith.select %36, %17, %37 : vector<10x18x4xi1>, vector<10x18x4xf32>
    %39 = arith.truncf %38 : vector<10x18x4xf32> to vector<10x18x4xbf16>
    %40 = vector.extract_strided_slice %39 {offsets = [0, 0, 0], sizes = [8, 16, 4], strides = [1, 1, 1]} : vector<10x18x4xbf16> to vector<8x16x4xbf16>
    %41 = vector.shape_cast %40 : vector<8x16x4xbf16> to vector<128x4xbf16>
    %42 = vector.extract_strided_slice %39 {offsets = [0, 1, 0], sizes = [8, 16, 4], strides = [1, 1, 1]} : vector<10x18x4xbf16> to vector<8x16x4xbf16>
    %43 = vector.shape_cast %42 : vector<8x16x4xbf16> to vector<128x4xbf16>
    %44 = vector.extract_strided_slice %39 {offsets = [0, 2, 0], sizes = [8, 16, 4], strides = [1, 1, 1]} : vector<10x18x4xbf16> to vector<8x16x4xbf16>
    %45 = vector.shape_cast %44 : vector<8x16x4xbf16> to vector<128x4xbf16>
    %46 = vector.extract_strided_slice %39 {offsets = [1, 0, 0], sizes = [8, 16, 4], strides = [1, 1, 1]} : vector<10x18x4xbf16> to vector<8x16x4xbf16>
    %47 = vector.shape_cast %46 : vector<8x16x4xbf16> to vector<128x4xbf16>
    %48 = vector.extract_strided_slice %39 {offsets = [1, 1, 0], sizes = [8, 16, 4], strides = [1, 1, 1]} : vector<10x18x4xbf16> to vector<8x16x4xbf16>
    %49 = vector.shape_cast %48 : vector<8x16x4xbf16> to vector<128x4xbf16>
    %50 = vector.extract_strided_slice %39 {offsets = [1, 2, 0], sizes = [8, 16, 4], strides = [1, 1, 1]} : vector<10x18x4xbf16> to vector<8x16x4xbf16>
    %51 = vector.shape_cast %50 : vector<8x16x4xbf16> to vector<128x4xbf16>
    %52 = vector.extract_strided_slice %39 {offsets = [2, 0, 0], sizes = [8, 16, 4], strides = [1, 1, 1]} : vector<10x18x4xbf16> to vector<8x16x4xbf16>
    %53 = vector.shape_cast %52 : vector<8x16x4xbf16> to vector<128x4xbf16>
    %54 = vector.extract_strided_slice %39 {offsets = [2, 1, 0], sizes = [8, 16, 4], strides = [1, 1, 1]} : vector<10x18x4xbf16> to vector<8x16x4xbf16>
    %55 = vector.shape_cast %54 : vector<8x16x4xbf16> to vector<128x4xbf16>
    %56 = vector.extract_strided_slice %39 {offsets = [2, 2, 0], sizes = [8, 16, 4], strides = [1, 1, 1]} : vector<10x18x4xbf16> to vector<8x16x4xbf16>
    %57 = vector.shape_cast %56 : vector<8x16x4xbf16> to vector<128x4xbf16>
    %58 = tpu.concatenate %41, %43, %45, %47, %49, %51, %53, %55, %57 in 1 : vector<128x4xbf16>, vector<128x4xbf16>, vector<128x4xbf16>, vector<128x4xbf16>, vector<128x4xbf16>, vector<128x4xbf16>, vector<128x4xbf16>, vector<128x4xbf16>, vector<128x4xbf16> -> vector<128x36xbf16>
    %c0_13 = arith.constant 0 : index
    %c0_14 = arith.constant 0 : index
    %59 = vector.load %arg6[%c0_13, %c0_14] : memref<36x4xbf16, #tpu.memory_space<vmem>>, vector<36x4xbf16>
    %cst_15 = arith.constant dense<0.000000e+00> : vector<128x4xf32>
    %60 = tpu.matmul %58, %59, %cst_15 {dimension_numbers = #tpu.dot_dimension_numbers<[1], [0], [0], [1], [0, 0, 1, 1], [], []>} : vector<128x36xbf16>, vector<36x4xbf16>, vector<128x4xf32> -> vector<128x4xf32>
    %61 = arith.truncf %60 : vector<128x4xf32> to vector<128x4xbf16>
    %c0_16 = arith.constant 0 : index
    %c0_17 = arith.constant 0 : index
    %c0_18 = arith.constant 0 : index
    %c0_19 = arith.constant 0 : index
    %62 = vector.load %arg7[%c0_16, %c0_17, %c0_18, %c0_19] : memref<1x1x128x4xbf16, #tpu.memory_space<vmem>>, vector<1x1x128x4xbf16>
    %63 = vector.shape_cast %62 : vector<1x1x128x4xbf16> to vector<128x4xbf16>
    %64 = vector.shape_cast %61 : vector<128x4xbf16> to vector<1x1x128x4xbf16>
    tpu.vector_store %arg7[%c0_16, %c0_17, %c0_18, %c0_19], %64 {strides = array<i32>} : memref<1x1x128x4xbf16, #tpu.memory_space<vmem>>, vector<1x1x128x4xbf16>,
    %cst_20 = arith.constant dense<0.000000e+00> : vector<4xf32>
    %65 = vector.multi_reduction <add>, %60, %cst_20 [0] : vector<128x4xf32> to vector<4xf32>
    %66 = vector.shape_cast %65 : vector<4xf32> to vector<1x4xf32>
    %67 = arith.mulf %60, %60 : vector<128x4xf32>
    %cst_21 = arith.constant dense<0.000000e+00> : vector<4xf32>
    %68 = vector.multi_reduction <add>, %67, %cst_21 [0] : vector<128x4xf32> to vector<4xf32>
    %69 = vector.shape_cast %68 : vector<4xf32> to vector<1x4xf32>
    %70 = tpu.concatenate %66, %69 in 0 : vector<1x4xf32>, vector<1x4xf32> -> vector<2x4xf32>
    %c0_22 = arith.constant 0 : index
    %c0_23 = arith.constant 0 : index
    %c0_24 = arith.constant 0 : index
    %c0_25 = arith.constant 0 : index
    %71 = vector.load %arg8[%c0_22, %c0_23, %c0_24, %c0_25] : memref<1x1x2x4xf32, #tpu.memory_space<vmem>>, vector<1x1x2x4xf32>
    %72 = vector.shape_cast %71 : vector<1x1x2x4xf32> to vector<2x4xf32>
    %73 = vector.shape_cast %70 : vector<2x4xf32> to vector<1x1x2x4xf32>
    tpu.vector_store %arg8[%c0_22, %c0_23, %c0_24, %c0_25], %73 {strides = array<i32>} : memref<1x1x2x4xf32, #tpu.memory_space<vmem>>, vector<1x1x2x4xf32>,
    return
  }
  func.func @transform_0(%arg0: i32, %arg1: i32) -> (i32, i32, i32, i32, i32) {
    %c0_i32 = arith.constant 0 : i32
    %c0_i32_0 = arith.constant 0 : i32
    %c0_i32_1 = arith.constant 0 : i32
    %c0_i32_2 = arith.constant 0 : i32
    return %arg0, %arg1, %c0_i32, %c0_i32_0, %c0_i32_1 : i32, i32, i32, i32, i32
  }
  func.func @transform_1(%arg0: i32, %arg1: i32) -> (i32, i32) {
    %c0_i32 = arith.constant 0 : i32
    %c0_i32_0 = arith.constant 0 : i32
    %c0_i32_1 = arith.constant 0 : i32
    return %c0_i32, %c0_i32_0 : i32, i32
  }
  func.func @transform_2(%arg0: i32, %arg1: i32) -> (i32, i32) {
    %c0_i32 = arith.constant 0 : i32
    %c0_i32_0 = arith.constant 0 : i32
    %c0_i32_1 = arith.constant 0 : i32
    return %c0_i32, %c0_i32_0 : i32, i32
  }
  func.func @transform_3(%arg0: i32, %arg1: i32) -> (i32, i32) {
    %c0_i32 = arith.constant 0 : i32
    %c0_i32_0 = arith.constant 0 : i32
    %c0_i32_1 = arith.constant 0 : i32
    return %c0_i32, %c0_i32_0 : i32, i32
  }
  func.func @transform_4(%arg0: i32, %arg1: i32) -> (i32, i32) {
    %c0_i32 = arith.constant 0 : i32
    %c0_i32_0 = arith.constant 0 : i32
    %c0_i32_1 = arith.constant 0 : i32
    return %c0_i32, %c0_i32_0 : i32, i32
  }
  func.func @transform_5(%arg0: i32, %arg1: i32) -> (i32, i32, i32, i32) {
    %c0_i32 = arith.constant 0 : i32
    %c0_i32_0 = arith.constant 0 : i32
    %c0_i32_1 = arith.constant 0 : i32
    return %arg0, %arg1, %c0_i32, %c0_i32_0 : i32, i32, i32, i32
  }
  func.func @transform_6(%arg0: i32, %arg1: i32) -> (i32, i32, i32, i32) {
    %c0_i32 = arith.constant 0 : i32
    %c0_i32_0 = arith.constant 0 : i32
    %c0_i32_1 = arith.constant 0 : i32
    return %arg0, %arg1, %c0_i32, %c0_i32_0 : i32, i32, i32, i32
  }
}

module attributes {stable_mosaic.version = 11 : i64} {
  func.func @_bn_residual_kernel(%arg0: i32, %arg1: i32, %arg2: memref<1x1x128x4xbf16, #tpu.memory_space<vmem>>, %arg3: memref<1x1x128x4xf32, #tpu.memory_space<vmem>>, %arg4: memref<1x4xf32, #tpu.memory_space<vmem>>, %arg5: memref<1x4xf32, #tpu.memory_space<vmem>>, %arg6: memref<1x1x128x4xf32, #tpu.memory_space<vmem>>) attributes {dimension_semantics = [#tpu.dimension_semantics<parallel>, #tpu.dimension_semantics<parallel>], iteration_bounds = array<i64: 2, 2>, scalar_prefetch = 0 : i64, scratch_operands = 0 : i64, tpu.core_type = #tpu.core_type<tc>, window_params = [{transform_indices = @transform_0, window_bounds = array<i64: 1, 1, 128, 4>}, {transform_indices = @transform_1, window_bounds = array<i64: 1, 1, 128, 4>}, {pipeline_mode = #tpu.pipeline_mode<synchronous>, transform_indices = @transform_2, window_bounds = array<i64: 1, 4>}, {pipeline_mode = #tpu.pipeline_mode<synchronous>, transform_indices = @transform_3, window_bounds = array<i64: 1, 4>}, {transform_indices = @transform_4, window_bounds = array<i64: 1, 1, 128, 4>}]} {
    %c0 = arith.constant 0 : index
    %c0_0 = arith.constant 0 : index
    %c0_1 = arith.constant 0 : index
    %c0_2 = arith.constant 0 : index
    %0 = vector.load %arg2[%c0, %c0_0, %c0_1, %c0_2] : memref<1x1x128x4xbf16, #tpu.memory_space<vmem>>, vector<1x1x128x4xbf16>
    %1 = vector.shape_cast %0 : vector<1x1x128x4xbf16> to vector<128x4xbf16>
    %2 = arith.extf %1 : vector<128x4xbf16> to vector<128x4xf32>
    %c0_3 = arith.constant 0 : index
    %c0_4 = arith.constant 0 : index
    %3 = vector.load %arg4[%c0_3, %c0_4] : memref<1x4xf32, #tpu.memory_space<vmem>>, vector<1x4xf32>
    %4 = vector.broadcast %3 : vector<1x4xf32> to vector<128x4xf32>
    %5 = arith.mulf %2, %4 : vector<128x4xf32>
    %c0_5 = arith.constant 0 : index
    %c0_6 = arith.constant 0 : index
    %6 = vector.load %arg5[%c0_5, %c0_6] : memref<1x4xf32, #tpu.memory_space<vmem>>, vector<1x4xf32>
    %7 = vector.broadcast %6 : vector<1x4xf32> to vector<128x4xf32>
    %8 = arith.addf %5, %7 : vector<128x4xf32>
    %c0_7 = arith.constant 0 : index
    %c0_8 = arith.constant 0 : index
    %c0_9 = arith.constant 0 : index
    %c0_10 = arith.constant 0 : index
    %9 = vector.load %arg3[%c0_7, %c0_8, %c0_9, %c0_10] : memref<1x1x128x4xf32, #tpu.memory_space<vmem>>, vector<1x1x128x4xf32>
    %10 = vector.shape_cast %9 : vector<1x1x128x4xf32> to vector<128x4xf32>
    %11 = arith.addf %8, %10 : vector<128x4xf32>
    %c0_11 = arith.constant 0 : index
    %c0_12 = arith.constant 0 : index
    %c0_13 = arith.constant 0 : index
    %c0_14 = arith.constant 0 : index
    %12 = vector.load %arg6[%c0_11, %c0_12, %c0_13, %c0_14] : memref<1x1x128x4xf32, #tpu.memory_space<vmem>>, vector<1x1x128x4xf32>
    %13 = vector.shape_cast %12 : vector<1x1x128x4xf32> to vector<128x4xf32>
    %14 = vector.shape_cast %11 : vector<128x4xf32> to vector<1x1x128x4xf32>
    tpu.vector_store %arg6[%c0_11, %c0_12, %c0_13, %c0_14], %14 {strides = array<i32>} : memref<1x1x128x4xf32, #tpu.memory_space<vmem>>, vector<1x1x128x4xf32>,
    return
  }
  func.func @transform_0(%arg0: i32, %arg1: i32) -> (i32, i32, i32, i32) {
    %c0_i32 = arith.constant 0 : i32
    %c0_i32_0 = arith.constant 0 : i32
    %c0_i32_1 = arith.constant 0 : i32
    return %arg0, %arg1, %c0_i32, %c0_i32_0 : i32, i32, i32, i32
  }
  func.func @transform_1(%arg0: i32, %arg1: i32) -> (i32, i32, i32, i32) {
    %c0_i32 = arith.constant 0 : i32
    %c0_i32_0 = arith.constant 0 : i32
    %c0_i32_1 = arith.constant 0 : i32
    return %arg0, %arg1, %c0_i32, %c0_i32_0 : i32, i32, i32, i32
  }
  func.func @transform_2(%arg0: i32, %arg1: i32) -> (i32, i32) {
    %c0_i32 = arith.constant 0 : i32
    %c0_i32_0 = arith.constant 0 : i32
    %c0_i32_1 = arith.constant 0 : i32
    return %c0_i32, %c0_i32_0 : i32, i32
  }
  func.func @transform_3(%arg0: i32, %arg1: i32) -> (i32, i32) {
    %c0_i32 = arith.constant 0 : i32
    %c0_i32_0 = arith.constant 0 : i32
    %c0_i32_1 = arith.constant 0 : i32
    return %c0_i32, %c0_i32_0 : i32, i32
  }
  func.func @transform_4(%arg0: i32, %arg1: i32) -> (i32, i32, i32, i32) {
    %c0_i32 = arith.constant 0 : i32
    %c0_i32_0 = arith.constant 0 : i32
    %c0_i32_1 = arith.constant 0 : i32
    return %arg0, %arg1, %c0_i32, %c0_i32_0 : i32, i32, i32, i32
  }
}

</mosaic_0001>

<bundles_post_ra>
// kernel: residual_block.5
= control target key start
LH: loop header
LB: loop body
LE: loop exit
PB: predicated region body
PF: predicated region fallthrough
CT: control target
= control target key end

     0   :  { %s673_s15 = smov 0   ;;  %s675_s16 = smov 0   ;;  %s839_s0 = inlined_call_operand.vmem [shape: bf16[2,2,128,4], index: 0, kind: input, shape index: {}]   ;;  %s840_s1 = inlined_call_operand.vmem [shape: f32[2,2,128,4], index: 1, kind: input, shape index: {}]   ;;  %s841_s2 = inlined_call_operand.vmem [shape: f32[1,4], index: 2, kind: input, shape index: {}]   ;;  %s842_s3 = inlined_call_operand.vmem [shape: f32[1,4], index: 3, kind: input, shape index: {}]   ;;  %s843_s4 = inlined_call_operand.vmem [shape: f32[2,2,128,4], index: 4, kind: output, shape index: {}]  }
   0x1   :  { %s677_s17 = smov 0   ;;  %s679_s18 = smov 0  }
   0x2   :  { %s681_s19 = smov 0  }
   0x3 LB: > { %s23_s20 = sadd.s32 1, %s638_s17  ;;  %s26_s21 = sadd.s32 1, %s642_s18  ;;  %s646_s19 = sphi %s681_s19, %s14_s19   ;;  %s642_s18 = sphi %s679_s18, %s847_s18   ;;  %s638_s17 = sphi %s677_s17, %s846_s17   ;;  %s634_s16 = sphi %s675_s16, %s845_s16   ;;  %s630_s15 = sphi %s673_s15, %s844_s15  }
   0x4   : > { %p24_p0 = scmp.ge.s32.totalorder %s23_s20, 2  ;;  %p515_p1 = scmp.ge.s32.totalorder %s646_s19, 1 }
   0x5   : > { %p198_p2 = scmp.lt.s32.totalorder %s646_s19, 5 }
   0x6   : > { %s849_s20 = smov (%p24_p0, %s23_s20), 0  ;;  %s851_s21 = smov (!%p24_p0, %s26_s21), %s642_s18 }
   0x7   : > { %p199_p3 = pnand %p515_p1, %p198_p2  ;;  %p28_p4 = scmp.ge.s32.totalorder %s851_s21, 2 }
   0x8   : > { %p241_p5 = scmp.lt.s32.totalorder (!%p199_p3), %s634_s16, 1  ;;  %p243_p6 = scmp.lt.s32.totalorder (!%p199_p3), %s630_s15, 1  ;;  %v716_v1 = vld [vmem:[%s841_s2] ss:$0 sm:$0xff] (!%p199_p3)  ;;  %vm378_vm0 = vcmask (!%p199_p3), 31744  }
   0x9   : > { %s853_s21 = smov (%p28_p4, %s851_s21), 0  ;;  %202 = sbr.rel (%p199_p3) target bundleno = 42 (0x2a), region = 36 }
   0xa   : > { %v729_v5 = vld [vmem:[%s842_s3] ss:$0 sm:$0xff] (!%p199_p3) }
  0x10   : > { %s855_s16 = smov (!%p241_p5, %s634_s16), 1  ;;  %s857_s15 = smov (!%p243_p6, %s630_s15), 1 }
  0x11   : > { %s517_s22 = sshll.u32 %s855_s16, 5  ;;  %s516_s23 = sshll.u32 %s857_s15, 4 }
  0x12   : > { %s703_s24 = sadd.s32 %s517_s22, %s516_s23 }
  0x13   : > { %s518_s25 = sshll.u32 %s703_s24, 2  ;;  %s521_s26 = sshll.u32 %s703_s24, 3 }
  0x14   : > { %s710_s29 = scalar_lea.vmem %s839_s0, %s518_s25  ;;  %s723_s8 = scalar_lea.vmem %s840_s1, %s521_s26 }
  0x15   : > { %v530_v0 = vld [vmem:[%s710_s29] sm:$0xff]   ;;  %v561_v4 = vld [vmem:[%s710_s29 + $0x8] sm:$0xff]   ;;  %v562_v8 = vld [vmem:[%s710_s29 + $0x10] sm:$0xff]   ;;  %s750_s13 = scalar_lea.vmem %s843_s4, %s521_s26 }
  0x16   : > { %v531_v2 = vunpack.c.l.bf16 %v530_v0  ;;  %v532_v3 = vunpack.c.h.bf16 %v530_v0  ;;  %v535_v6 = vunpack.c.l.bf16 %v561_v4  ;;  %v536_v7 = vunpack.c.h.bf16 %v561_v4  ;;  %v563_v13 = vld [vmem:[%s710_s29 + $0x18] sm:$0xff]   ;;  %v346_v14 = vld [vmem:[%s723_s8] sm:$0xff]  ;;  %v347_v15 = vld [vmem:[%s723_s8 + $0x8] sm:$0xff] }
  0x17   : > { %v539_v11 = vunpack.c.l.bf16 %v562_v8  ;;  %v540_v12 = vunpack.c.h.bf16 %v562_v8  ;;  %v543_v18 = vunpack.c.l.bf16 %v563_v13  ;;  %v544_v19 = vunpack.c.h.bf16 %v563_v13  ;;  %v348_v22 = vld [vmem:[%s723_s8 + $0x10] sm:$0xff]  ;;  %v349_v23 = vld [vmem:[%s723_s8 + $0x18] sm:$0xff]  ;;  %v350_v28 = vld [vmem:[%s723_s8 + $0x20] sm:$0xff] }
  0x18   : > { %v307_v9 = vmul.f32 %v531_v2, %v716_v1  ;;  %v308_v10 = vmul.f32 %v532_v3, %v716_v1  ;;  %v309_v16 = vmul.f32 %v535_v6, %v716_v1  ;;  %v310_v17 = vmul.f32 %v536_v7, %v716_v1  ;;  %v351_v29 = vld [vmem:[%s723_s8 + $0x28] sm:$0xff]  ;;  %v564_v32 = vld [vmem:[%s710_s29 + $0x20] sm:$0xff]   ;;  %v352_v37 = vld [vmem:[%s723_s8 + $0x30] sm:$0xff] }
  0x19   : > { %v311_v24 = vmul.f32 %v539_v11, %v716_v1  ;;  %v312_v25 = vmul.f32 %v540_v12, %v716_v1  ;;  %v313_v30 = vmul.f32 %v543_v18, %v716_v1  ;;  %v314_v31 = vmul.f32 %v544_v19, %v716_v1  ;;  %v353_v38 = vld [vmem:[%s723_s8 + $0x38] sm:$0xff]  ;;  %v565_v39 = vld [vmem:[%s710_s29 + $0x28] sm:$0xff]   ;;  %v566_v44 = vld [vmem:[%s710_s29 + $0x30] sm:$0xff]  }
  0x1a   : > { %v330_v20 = vadd.f32 %v729_v5, %v307_v9  ;;  %v331_v21 = vadd.f32 %v729_v5, %v308_v10  ;;  %v332_v26 = vadd.f32 %v729_v5, %v309_v16  ;;  %v333_v27 = vadd.f32 %v729_v5, %v310_v17  ;;  %v567_v49 = vld [vmem:[%s710_s29 + $0x38] sm:$0xff]   ;;  %v354_v58 = vld [vmem:[%s723_s8 + $0x40] sm:$0xff]  ;;  %v355_v59 = vld [vmem:[%s723_s8 + $0x48] sm:$0xff] }
  0x1b   : > { %v334_v35 = vadd.f32 %v729_v5, %v311_v24  ;;  %v335_v36 = vadd.f32 %v729_v5, %v312_v25  ;;  %v336_v42 = vadd.f32 %v729_v5, %v313_v30  ;;  %v337_v43 = vadd.f32 %v729_v5, %v314_v31  ;;  %v356_v3 = vld [vmem:[%s723_s8 + $0x50] sm:$0xff]  ;;  %v357_v4 = vld [vmem:[%s723_s8 + $0x58] sm:$0xff]  ;;  %v358_v10 = vld [vmem:[%s723_s8 + $0x60] sm:$0xff] }
  0x1c   : > { %v362_v33 = vadd.f32 %v346_v14, %v330_v20  ;;  %v363_v34 = vadd.f32 %v347_v15, %v331_v21  ;;  %v364_v40 = vadd.f32 %v348_v22, %v332_v26  ;;  %v365_v41 = vadd.f32 %v349_v23, %v333_v27  ;;  %v359_v11 = vld [vmem:[%s723_s8 + $0x68] sm:$0xff]  ;;  %v360_v18 = vld [vmem:[%s723_s8 + $0x70] sm:$0xff]  ;;  %v361_v19 = vld [vmem:[%s723_s8 + $0x78] sm:$0xff] }
  0x1d   : > { %v366_v45 = vadd.f32 %v350_v28, %v334_v35  ;;  %v367_v46 = vadd.f32 %v351_v29, %v335_v36  ;;  %v547_v47 = vunpack.c.l.bf16 %v564_v32  ;;  %v548_v48 = vunpack.c.h.bf16 %v564_v32 }
  0x1e   : > { %379 = vst.msk [vmem:[%s750_s13] sm:$0xff] %vm378_vm0, %v362_v33  ;;  %380 = vst.msk [vmem:[%s750_s13 + $0x8] sm:$0xff] %vm378_vm0, %v363_v34  ;;  %v368_v50 = vadd.f32 %v352_v37, %v336_v42  ;;  %v369_v51 = vadd.f32 %v353_v38, %v337_v43  ;;  %v551_v52 = vunpack.c.l.bf16 %v565_v39  ;;  %v552_v53 = vunpack.c.h.bf16 %v565_v39 }
  0x1f   : > { %381 = vst.msk [vmem:[%s750_s13 + $0x10] sm:$0xff] %vm378_vm0, %v364_v40  ;;  %382 = vst.msk [vmem:[%s750_s13 + $0x18] sm:$0xff] %vm378_vm0, %v365_v41  ;;  %v315_v54 = vmul.f32 %v547_v47, %v716_v1  ;;  %v316_v55 = vmul.f32 %v548_v48, %v716_v1  ;;  %v555_v56 = vunpack.c.l.bf16 %v566_v44  ;;  %v556_v57 = vunpack.c.h.bf16 %v566_v44 }
  0x20   : > { %383 = vst.msk [vmem:[%s750_s13 + $0x20] sm:$0xff] %vm378_vm0, %v366_v45  ;;  %384 = vst.msk [vmem:[%s750_s13 + $0x28] sm:$0xff] %vm378_vm0, %v367_v46  ;;  %v317_v60 = vmul.f32 %v551_v52, %v716_v1  ;;  %v318_v61 = vmul.f32 %v552_v53, %v716_v1  ;;  %v559_v62 = vunpack.c.l.bf16 %v567_v49  ;;  %v560_v63 = vunpack.c.h.bf16 %v567_v49 }
  0x21   : > { %385 = vst.msk [vmem:[%s750_s13 + $0x30] sm:$0xff] %vm378_vm0, %v368_v50  ;;  %386 = vst.msk [vmem:[%s750_s13 + $0x38] sm:$0xff] %vm378_vm0, %v369_v51  ;;  %v338_v0 = vadd.f32 %v729_v5, %v315_v54  ;;  %v339_v2 = vadd.f32 %v729_v5, %v316_v55  ;;  %v319_v6 = vmul.f32 %v555_v56, %v716_v1 }
  0x22   : > { %v320_v7 = vmul.f32 %v556_v57, %v716_v1  ;;  %v340_v8 = vadd.f32 %v729_v5, %v317_v60  ;;  %v341_v9 = vadd.f32 %v729_v5, %v318_v61  ;;  %v321_v12 = vmul.f32 %v559_v62, %v716_v1 }
  0x23   : > { %v322_v13 = vmul.f32 %v560_v63, %v716_v1  ;;  %v370_v14 = vadd.f32 %v354_v58, %v338_v0  ;;  %v371_v15 = vadd.f32 %v355_v59, %v339_v2  ;;  %v342_v16 = vadd.f32 %v729_v5, %v319_v6 }
  0x24   : > { %v343_v17 = vadd.f32 %v729_v5, %v320_v7  ;;  %v372_v20 = vadd.f32 %v356_v3, %v340_v8  ;;  %v373_v21 = vadd.f32 %v357_v4, %v341_v9  ;;  %v344_v22 = vadd.f32 %v729_v5, %v321_v12 }
  0x25   : > { %v345_v23 = vadd.f32 %v729_v5, %v322_v13  ;;  %387 = vst.msk [vmem:[%s750_s13 + $0x40] sm:$0xff] %vm378_vm0, %v370_v14  ;;  %388 = vst.msk [vmem:[%s750_s13 + $0x48] sm:$0xff] %vm378_vm0, %v371_v15  ;;  %v374_v1 = vadd.f32 %v358_v10, %v342_v16 }
  0x26   : > { %v375_v24 = vadd.f32 %v359_v11, %v343_v17  ;;  %389 = vst.msk [vmem:[%s750_s13 + $0x50] sm:$0xff] %vm378_vm0, %v372_v20  ;;  %390 = vst.msk [vmem:[%s750_s13 + $0x58] sm:$0xff] %vm378_vm0, %v373_v21  ;;  %v376_v25 = vadd.f32 %v360_v18, %v344_v22 }
  0x27   : > { %v377_v26 = vadd.f32 %v361_v19, %v345_v23  ;;  %391 = vst.msk [vmem:[%s750_s13 + $0x60] sm:$0xff] %vm378_vm0, %v374_v1 }
  0x28   : > { %392 = vst.msk [vmem:[%s750_s13 + $0x68] sm:$0xff] %vm378_vm0, %v375_v24  ;;  %393 = vst.msk [vmem:[%s750_s13 + $0x70] sm:$0xff] %vm378_vm0, %v376_v25 }
  0x29   : > { %394 = vst.msk [vmem:[%s750_s13 + $0x78] sm:$0xff] %vm378_vm0, %v377_v26 }
  0x2a PF: > { %s14_s19 = sadd.s32 1, %s646_s19   ;;  %s844_s15 = smov %s638_s17 }
  0x2b   : > { %p11_p7 = scmp.ge.s32.totalorder %s14_s19, 6   ;;  %s845_s16 = smov %s642_s18 }
  0x2c   : > { %s846_s17 = smov %s849_s20  ;;  %s847_s18 = smov %s853_s21 }
  0x2d   :  { %13 = sbr.rel (!%p11_p7) target bundleno = 3 (0x3), region = 69 }

// kernel: residual_block.3
= control target key start
LH: loop header
LB: loop body
LE: loop exit
PB: predicated region body
PF: predicated region fallthrough
CT: control target
= control target key end

     0   :  { %s1690_s12 = smov 0   ;;  %s1692_s13 = smov 0   ;;  %s2341_s0 = inlined_call_operand.vmem [shape: bf16[2,2,10,18,4], index: 0, kind: input, shape index: {}]   ;;  %s2342_s1 = inlined_call_operand.vmem [shape: bf16[36,4], index: 1, kind: input, shape index: {}]   ;;  %s2343_s2 = inlined_call_operand.vmem [shape: bf16[2,2,128,4], index: 2, kind: output, shape index: {0}]   ;;  %s2344_s3 = inlined_call_operand.vmem [shape: f32[2,2,2,4], index: 3, kind: output, shape index: {1}]  }
   0x1   :  { %s1694_s14 = smov 0   ;;  %s1696_s15 = smov 0  }
   0x2   :  { %s1698_s16 = smov 0  }
   0x3 LB: > { %s23_s17 = sadd.s32 1, %s1652_s14  ;;  %s26_s18 = sadd.s32 1, %s1656_s15  ;;  %s1660_s16 = sphi %s1698_s16, %s14_s16   ;;  %s1656_s15 = sphi %s1696_s15, %s2352_s15   ;;  %s1652_s14 = sphi %s1694_s14, %s2351_s14   ;;  %s1648_s13 = sphi %s1692_s13, %s2350_s13   ;;  %s1644_s12 = sphi %s1690_s12, %s2349_s12  }
   0x4   : > { %p24_p0 = scmp.ge.s32.totalorder %s23_s17, 2  ;;  %p1426_p1 = scmp.ge.s32.totalorder %s1660_s16, 1 }
   0x5   : > { %p162_p2 = scmp.lt.s32.totalorder %s1660_s16, 5 }
   0x6   : > { %s2354_s17 = smov (%p24_p0, %s23_s17), 0  ;;  %s2356_s18 = smov (!%p24_p0, %s26_s18), %s1656_s15 }
   0x7   : > { %p163_p3 = pnand %p1426_p1, %p162_p2  ;;  %p28_p4 = scmp.ge.s32.totalorder %s2356_s18, 2 }
   0x8   : > { %p202_p5 = scmp.lt.s32.totalorder (!%p163_p3), %s1648_s13, 1  ;;  %p204_p6 = scmp.lt.s32.totalorder (!%p163_p3), %s1644_s12, 1  ;;  %vm478_vm0 = vcmask (!%p163_p3), 1042432   ;;  %vm479_vm1 = vcmask (!%p163_p3), 1046532   ;;  %vm259_vm2 = vsmask.f32 (!%p163_p3), 3328 }
   0x9   : > { %s2358_s18 = smov (%p28_p4, %s2356_s18), 0  ;;  %166 = sbr.rel (%p163_p3) target bundleno = 509 (0x1fd), region = 28 }
   0xa   : > { %vm260_vm3 = vsmask.f32 (!%p163_p3), 7440  ;;  %s1662_s26 = smov (!%p163_p3), 12   ;;  %vm1775_vm4 = vmor (!%p163_p3), %vm478_vm0, %vm479_vm1  ;;  %s1663_s27 = smov (!%p163_p3), 24   ;;  %vm1004_vm6 = vcmask (!%p163_p3), 1041408   ;;  %vm823_vm7 = vcmask (!%p163_p3), 31744  }
   0xb   : > { %s1664_s28 = smov (!%p163_p3), 20   ;;  %vm1811_vm5 = vmor (!%p163_p3), %vm259_vm2, %vm260_vm3  ;;  %s1665_s29 = smov (!%p163_p3), 8   ;;  %vm848_vm8 = vcmask (!%p163_p3), 64512   ;;  %vm865_vm9 = vcmask (!%p163_p3), 97280   ;;  %vm882_vm10 = vcmask (!%p163_p3), 130048   ;;  %vm899_vm11 = vcmask (!%p163_p3), 162816  }
   0xc   : > { %s1666_s30 = smov (!%p163_p3), 4   ;;  %s1667_s8 = smov (!%p163_p3), 16   ;;  %vm916_vm12 = vcmask (!%p163_p3), 195584   ;;  %vm933_vm13 = vcmask (!%p163_p3), 228352   ;;  %vm950_vm14 = vcmask (!%p163_p3), 261120   ;;  %vm987_vm15 = vcmask (!%p163_p3), 293888  }
   0xd   : > { %s1668_s9 = smov (!%p163_p3), 28   ;;  %s1669_s10 = smov (!%p163_p3), 32   ;;  %vm1169_vm0 = vcmask (!%p163_p3), 27648   ;;  %vm1276_vm1 = vcmask (!%p163_p3), 1040384   ;;  %vm1278_vm2 = vcmask (!%p163_p3), 25600  }
  0x10   : > { %s2360_s13 = smov (!%p202_p5, %s1648_s13), 1  ;;  %s2362_s12 = smov (!%p204_p6, %s1644_s12), 1 }
  0x11   : > { %s1560_s19 = smul.u32 60, %s2360_s13 }
  0x12   : > { %s1559_s20 = smul.u32 30, %s2362_s12 }
  0x14   : > { %s208_s21 = sadd.s32 %s1560_s19, %s1559_s20  ;;  %s1428_s20 = sshll.u32 %s2362_s12, 4 }
  0x15   : > { %s1427_s22 = sshll.u32 %s208_s21, 2  ;;  %s1429_s21 = sshll.u32 %s2360_s13, 5 }
  0x16   : > { %s1729_s25 = scalar_lea.vmem %s2341_s0, %s1427_s22  ;;  %s217_s22 = sadd.s32 %s1429_s21, %s1428_s20 }
  0x17   : > { %v1732_v0 = vld [vmem:[%s1729_s25 + $0x18] sm:$0xf]  ;;  %v1735_v1 = vld [vmem:[%s1729_s25 + $0x1c] sm:$0xf]  ;;  %v232_v2 = vld [vmem:[%s1729_s25 + $0xc] sm:$0xf] }
  0x18   : > { %v324_v3 = vshrl.u32 %v1735_v1, 16  ;;  %v1741_v4 = vcombine.low %v1732_v0, %v1735_v1  ;;  %v311_v5 = vshrl.u32 %v1732_v0, 16  ;;  %v314_v6 = vshll.u32 %v1732_v0, 16  ;;  %v1746_v7 = vld [vmem:[%s1729_s25 + $0x10] sm:$0xf]  ;;  %s1430_s23 = sshll.u32 %s217_s22, 2 }
  0x19   : > { %v296_v8 = vshll.u32 %v1746_v7, 16  ;;  %v300_v9 = vshrl.u32 %v1746_v7, 16  ;;  %v1751_v10 = vcombine.low %v232_v2, %v1746_v7  ;;  %v287_v11 = vshrl.u32 %v232_v2, 16  ;;  %v1754_v12 = vld [vmem:[%s1729_s25 + $0x24] sm:$0xf] }
  0x1a   : > { %714 = vrot.lane.b32.xlu1 %v1741_v4, %s1662_s26  ;;  %v290_v13 = vshll.u32 %v232_v2, 16  ;;  %v1759_v14 = vld [vmem:[%s1729_s25 + $0x28] sm:$0xf]  ;;  %v335_v15 = vshrl.u32 %v1754_v12, 16  ;;  %v338_v16 = vshll.u32 %v1754_v12, 16  ;;  %v1434_v17 = vrot.slane %v232_v2, 9 }
  0x1b   : > { %v1763_v18 = vrot.slane %v300_v9, 4  ;;  %712 = vrot.lane.b32.xlu0 %v1751_v10, %s1662_s26  ;;  %v289_v19 = vrot.slane %v287_v11, 4  ;;  %v348_v20 = vshrl.u32 %v1759_v14, 16  ;;  %v1770_v21 = vcombine.low %v1754_v12, %v1759_v14  ;;  %v234_v22 = vld [vmem:[%s1729_s25 + $0x14] sm:$0x1] }
  0x1c   : > { %v292_v24 = vrot.slane %v290_v13, 5  ;;  %v490_v25 = vrot.slane %v1746_v7, 5  ;;  %v493_v26 = vrot.slane %v234_v22, 5  ;;  %v1781_v27 = vld [vmem:[%s1729_s25] sm:$0xf]  ;;  %v1435_v28 = vrot.slane %v1732_v0, 9 }
  0x1d   : > { %v1785_v29 = vld [vmem:[%s1729_s25 + $0x4] sm:$0xf]  ;;  %v231_v30 = vld [vmem:[%s1729_s25 + $0x8] sm:$0x1]  ;;  %v1433_v31 = vrot.slane %v1781_v27, 9  ;;  %v263_v32 = vshrl.u32 %v1781_v27, 16 }
  0x1e   : > { %771 = vrot.lane.b32.xlu1 %v1770_v21, %s1663_s27  ;;  %v491_v33 = vsel %vm1775_vm4, %v1434_v17, %v490_v25  ;;  %v492_v34 = vrot.slane %v490_v25, 4  ;;  %v483_v35 = vrot.slane %v1785_v29, 5  ;;  %v486_v36 = vrot.slane %v231_v30, 5  ;;  %v237_v41 = vld [vmem:[%s1729_s25 + $0x20] sm:$0x1] }
  0x1f   : > { %769 = vrot.lane.b32.xlu0 %v1741_v4, %s1663_s27  ;;  %v265_v37 = vrot.slane %v263_v32, 4  ;;  %v266_v38 = vshll.u32 %v1781_v27, 16  ;;  %v272_v39 = vshll.u32 %v1785_v29, 16  ;;  %v276_v40 = vshrl.u32 %v1785_v29, 16 }
  0x20   : > { %v494_v42 = vsel %vm1775_vm4, %v492_v34, %v493_v26  ;;  %v484_v43 = vsel %vm1775_vm4, %v1433_v31, %v483_v35  ;;  %v485_v44 = vrot.slane %v483_v35, 4  ;;  %v282_v45 = vshll.u32 %v231_v30, 16  ;;  %v1840_v30 = vld [vmem:[%s1729_s25 + $0x2c] sm:$0x1] }
  0x21   : > { %v1460_v46 = vcombine.low %v491_v33, %v494_v42  ;;  %v268_v47 = vrot.slane %v266_v38, 5  ;;  %v274_v48 = vrot.slane %v272_v39, 5  ;;  %v278_v49 = vrot.slane %v276_v40, 4  ;;  %v1620_v38 = vld [vmem:[%s2342_s1 + $0x8] sm:$0xff]  }
  0x22   : > { %v487_v50 = vsel %vm1775_vm4, %v485_v44, %v486_v36  ;;  %v284_v51 = vrot.slane %v282_v45, 5  ;;  %v497_v52 = vrot.slane %v1735_v1, 5  ;;  %v500_v53 = vrot.slane %v237_v41, 5  ;;  %v242_v45 = vld [vmem:[%s1729_s25 + $0x34] sm:$0xf] }
  0x23   : > { %750 = vrot.lane.b32.xlu0 %v1460_v46, %s1664_s28  ;;  %v1459_v54 = vcombine.low %v484_v43, %v487_v50  ;;  %v269_v55 = vor.u32 %v268_v47, %v265_v37  ;;  %v279_v56 = vor.u32 %v278_v49, %v274_v48  ;;  %v293_v57 = vor.u32 %v292_v24, %v289_v19  ;;  %v1856_v37 = vld [vmem:[%s1729_s25 + $0x30] sm:$0xf] }
  0x24   : > { %v498_v59 = vsel %vm1775_vm4, %v1435_v28, %v497_v52  ;;  %v499_v60 = vrot.slane %v497_v52, 4  ;;  %v298_v61 = vrot.slane %v296_v8, 5  ;;  %v306_v62 = vshll.u32 %v234_v22, 16 }
  0x25   : > { %693 = vrot.lane.b32.xlu1 %v1459_v54, %s1665_s29  ;;  %v270_v63 = vrot.slane %v269_v55, 4  ;;  %v280_v2 = vrot.slane %v279_v56, 4  ;;  %v294_v9 = vrot.slane %v293_v57, 4  ;;  %v313_v11 = vrot.slane %v311_v5, 4  ;;  %v243_v56 = vld [vmem:[%s1729_s25 + $0x38] sm:$0x1] }
  0x26   : > { %v501_v13 = vsel %vm1775_vm4, %v499_v60, %v500_v53  ;;  %v303_v17 = vor.u32 %v1763_v18, %v298_v61  ;;  %v308_v19 = vrot.slane %v306_v62, 5  ;;  %v316_v7 = vrot.slane %v314_v6, 5 }
  0x27   : > { %v275_v8 = vsel %vm1811_vm5, %v270_v63, %v274_v48  ;;  %v285_v22 = vsel %vm1811_vm5, %v280_v2, %v284_v51  ;;  %v1831_v24 = vcombine.low %v498_v59, %v501_v13  ;;  %v299_v5 = vsel %vm1811_vm5, %v294_v9, %v298_v61  ;;  %v1879_v61 = vld [vmem:[%s1729_s25 + $0x3c] sm:$0xf] }
  0x28   : > { %v1451_v25 = vcombine.low %v275_v8, %v285_v22  ;;  %v304_v26 = vrot.slane %v303_v17, 4  ;;  %v317_v28 = vor.u32 %v316_v7, %v313_v11  ;;  %v320_v18 = vshll.u32 %v1735_v1, 16  ;;  %v1888_v17 = vld [vmem:[%s1729_s25 + $0x40] sm:$0xf] }
  0x29   : > { %695 = vrot.lane.b32.xlu1 %v1460_v46, %s1665_s29  ;;  %v326_v0 = vrot.slane %v324_v3, 4  ;;  %v330_v6 = vshll.u32 %v237_v41, 16  ;;  %v337_v31 = vrot.slane %v335_v15, 4  ;;  %v340_v32 = vrot.slane %v338_v16, 5  ;;  %v1619_v3 = vld [vmem:[%s2342_s1] sm:$0xff]  }
  0x2a   : > { %653 = vrot.lane.b32.xlu0 %v1451_v25, %s1666_s30  ;;  %v309_v33 = vsel %vm1811_vm5, %v304_v26, %v308_v19  ;;  %v318_v34 = vrot.slane %v317_v28, 4  ;;  %v322_v35 = vrot.slane %v320_v18, 5  ;;  %v344_v1 = vshll.u32 %v1759_v14, 16  ;;  %1529 = vmatprep.subr.bf16.mxu0 %v1619_v3 }
  0x2b   : > { %v1452_v36 = vcombine.low %v299_v5, %v309_v33  ;;  %v341_v15 = vor.u32 %v340_v32, %v337_v31  ;;  %v350_v16 = vrot.slane %v348_v20, 4  ;;  %v332_v40 = vrot.slane %v330_v6, 5  ;;  %1551 = vmatprep.subr.bf16.mxu1 %v1619_v3  ;;  %1530 = vmatpush3.bf16.msra.mxu0 %v1619_v3  ;;  %v1900_v31 = vld [vmem:[%s1729_s25 + $0x44] sm:$0x1] }
  0x2c   : > { %v327_v39 = vor.u32 %v326_v0, %v322_v35  ;;  %v346_v41 = vrot.slane %v344_v1, 5  ;;  %v354_v42 = vshll.u32 %v1840_v30, 16  ;;  %v323_v43 = vsel %vm1811_vm5, %v318_v34, %v322_v35  ;;  %1531 = vmatprep.subr.bf16.mxu0 %v1620_v38  ;;  %1554 = vmatpush3.bf16.msra.mxu1 %v1619_v3 }
  0x2d   : > { %752 = vrot.lane.b32.xlu1 %v1831_v24, %s1664_s28  ;;  %v342_v20 = vrot.slane %v341_v15, 4  ;;  %v504_v44 = vrot.slane %v1759_v14, 5  ;;  %v359_v49 = vshrl.u32 %v1856_v37, 16  ;;  %v1436_v50 = vrot.slane %v1754_v12, 9  ;;  %1552 = vmatprep.subr.bf16.mxu1 %v1620_v38 }
  0x2e   : > { %655 = vrot.lane.b32.xlu0 %v1452_v36, %s1666_s30  ;;  %v328_v46 = vrot.slane %v327_v39, 4  ;;  %v351_v47 = vor.u32 %v350_v16, %v346_v41  ;;  %v356_v48 = vrot.slane %v354_v42, 5  ;;  %v507_v51 = vrot.slane %v1840_v30, 5 }
  0x2f   : > { %v362_v52 = vshll.u32 %v1856_v37, 16  ;;  %v347_v53 = vsel %vm1811_vm5, %v342_v20, %v346_v41  ;;  %v372_v55 = vshrl.u32 %v242_v45, 16  ;;  %v506_v59 = vrot.slane %v504_v44, 4  ;;  %1532 = vmatpush3.bf16.msra.mxu0 %v1620_v38 }
  0x30   : > { %v333_v14 = vsel %vm1811_vm5, %v328_v46, %v332_v40  ;;  %v352_v54 = vrot.slane %v351_v47, 4  ;;  %v361_v60 = vrot.slane %v359_v49, 4  ;;  %v368_v63 = vshll.u32 %v242_v45, 16  ;;  %1555 = vmatpush3.bf16.msra.mxu1 %v1620_v38  ;;  %v1917_v40 = vld [vmem:[%s1729_s25 + $0x4c] sm:$0xf] }
  0x31   : > { %v1453_v57 = vcombine.low %v323_v43, %v333_v14  ;;  %v364_v12 = vrot.slane %v362_v52, 5  ;;  %v374_v2 = vrot.slane %v372_v55, 4  ;;  %v378_v13 = vshll.u32 %v243_v56, 16 }
  0x32   : > { %731 = vrot.lane.b32.xlu0 %v1452_v36, %s1667_s8  ;;  %v357_v62 = vsel %vm1811_vm5, %v352_v54, %v356_v48  ;;  %v505_v19 = vsel %vm1775_vm4, %v1436_v50, %v504_v44  ;;  %v370_v7 = vrot.slane %v368_v63, 5  ;;  %v511_v8 = vrot.slane %v242_v45, 5  ;;  %v1909_v36 = vld [vmem:[%s1729_s25 + $0x48] sm:$0xf] }
  0x33   : > { %733 = vrot.lane.b32.xlu1 %v1453_v57, %s1667_s8  ;;  %v1885_v9 = vcombine.low %v347_v53, %v357_v62  ;;  %v365_v11 = vor.u32 %v364_v12, %v361_v60  ;;  %v383_v22 = vshrl.u32 %v1879_v61, 16  ;;  %v508_v5 = vsel %vm1775_vm4, %v506_v59, %v507_v51  ;;  %v249_v51 = vld [vmem:[%s1729_s25 + $0x50] sm:$0x1]  ;;  %v1953_v60 = vld [vmem:[%s1729_s25 + $0x54] sm:$0xf] }
  0x34   : > { %v1437_v25 = vrot.slane %v1856_v37, 9  ;;  %v514_v26 = vrot.slane %v243_v56, 5  ;;  %v386_v28 = vshll.u32 %v1879_v61, 16  ;;  %v375_v0 = vor.u32 %v374_v2, %v370_v7 }
  0x35   : > { %v366_v18 = vrot.slane %v365_v11, 4  ;;  %v513_v6 = vrot.slane %v511_v8, 4  ;;  %v396_v30 = vshrl.u32 %v1888_v17, 16  ;;  %v380_v32 = vrot.slane %v378_v13, 5 }
  0x36   : > { %788 = vrot.lane.b32.xlu0 %v1453_v57, %s1668_s9  ;;  %v385_v33 = vrot.slane %v383_v22, 4  ;;  %v388_v34 = vrot.slane %v386_v28, 5  ;;  %v392_v35 = vshll.u32 %v1888_v17, 16  ;;  %v1906_v1 = vcombine.low %v1856_v37, %v242_v45 }
  0x37   : > { %790 = vrot.lane.b32.xlu1 %v1885_v9, %s1668_s9  ;;  %v376_v3 = vrot.slane %v375_v0, 4  ;;  %v512_v15 = vsel %vm1775_vm4, %v1437_v25, %v511_v8  ;;  %v515_v16 = vsel %vm1775_vm4, %v513_v6, %v514_v26  ;;  %v402_v39 = vshll.u32 %v1900_v31, 16  ;;  %v1969_v8 = vld [vmem:[%s1729_s25 + $0x58] sm:$0xf] }
  0x38   : > { %v389_v38 = vor.u32 %v388_v34, %v385_v33  ;;  %v1921_v37 = vcombine.low %v505_v19, %v508_v5  ;;  %v371_v41 = vsel %vm1811_vm5, %v366_v18, %v370_v7  ;;  %v1927_v42 = vcombine.low %v1879_v61, %v1888_v17 }
  0x39   : > { %v398_v43 = vrot.slane %v396_v30, 4  ;;  %v381_v20 = vsel %vm1811_vm5, %v376_v3, %v380_v32  ;;  %v1932_v44 = vrot.slane %v392_v35, 5  ;;  %v518_v45 = vrot.slane %v1888_v17, 5  ;;  %v252_v30 = vld [vmem:[%s1729_s25 + $0x5c] sm:$0x1] }
  0x3a   : > { %807 = vrot.lane.b32.xlu0 %v1831_v24, %s1669_s10  ;;  %v407_v46 = vshrl.u32 %v1909_v36, 16  ;;  %v1936_v47 = vcombine.low %v512_v15, %v515_v16  ;;  %v1938_v48 = vrot.slane %v389_v38, 4  ;;  %v410_v49 = vshll.u32 %v1909_v36, 16 }
  0x3b   : > { %657 = vrot.lane.b32.xlu1 %v1453_v57, %s1666_s30  ;;  %v420_v50 = vshrl.u32 %v1917_v40, 16  ;;  %v1943_v52 = vrot.slane %v402_v39, 5  ;;  %v1438_v14 = vrot.slane %v1879_v61, 9  ;;  %v521_v53 = vrot.slane %v1900_v31, 5 }
  0x3c   : > { %v409_v54 = vrot.slane %v407_v46, 4  ;;  %v1949_v55 = vcombine.low %v371_v41, %v381_v20  ;;  %v412_v56 = vrot.slane %v410_v49, 5  ;;  %v416_v57 = vshll.u32 %v1917_v40, 16  ;;  %v1989_v20 = vld [vmem:[%s1729_s25 + $0x60] sm:$0xf] }
  0x3d   : > { %v422_v59 = vrot.slane %v420_v50, 4  ;;  %v399_v12 = vor.u32 %v398_v43, %v1932_v44  ;;  %v1960_v62 = vrot.slane %v518_v45, 4  ;;  %v426_v63 = vshll.u32 %v249_v51, 16 }
  0x3e   : > { %809 = vrot.lane.b32.xlu0 %v1921_v37, %s1669_s10  ;;  %v1439_v2 = vrot.slane %v1909_v36, 9  ;;  %v395_v11 = vsel %vm1811_vm5, %v1938_v48, %v1932_v44  ;;  %v413_v13 = vor.u32 %v412_v56, %v409_v54  ;;  %v418_v19 = vrot.slane %v416_v57, 5  ;;  %v1998_v54 = vld [vmem:[%s1729_s25 + $0x64] sm:$0xf] }
  0x3f   : > { %659 = vrot.lane.b32.xlu1 %v1885_v9, %s1666_s30  ;;  %v525_v7 = vrot.slane %v1917_v40, 5  ;;  %v428_v22 = vrot.slane %v426_v63, 5  ;;  %v528_v5 = vrot.slane %v249_v51, 5  ;;  %v431_v25 = vshrl.u32 %v1953_v60, 16 }
  0x40   : > { %v434_v26 = vshll.u32 %v1953_v60, 16  ;;  %v414_v28 = vrot.slane %v413_v13, 4  ;;  %v423_v18 = vor.u32 %v422_v59, %v418_v19  ;;  %v400_v32 = vrot.slane %v399_v12, 4 }
  0x41   : > { %v526_v0 = vsel %vm1775_vm4, %v1439_v2, %v525_v7  ;;  %v527_v6 = vrot.slane %v525_v7, 4  ;;  %v444_v33 = vshrl.u32 %v1969_v8, 16  ;;  %v433_v34 = vrot.slane %v431_v25, 4  ;;  %v255_v7 = vld [vmem:[%s1729_s25 + $0x68] sm:$0x1] }
  0x42   : > { %697 = vrot.lane.b32.xlu0 %v1831_v24, %s1665_s29  ;;  %v436_v35 = vrot.slane %v434_v26, 5  ;;  %v419_v24 = vsel %vm1811_vm5, %v414_v28, %v418_v19  ;;  %v424_v3 = vrot.slane %v423_v18, 4  ;;  %v440_v16 = vshll.u32 %v1969_v8, 16 }
  0x43   : > { %699 = vrot.lane.b32.xlu1 %v1921_v37, %s1665_s29  ;;  %v529_v15 = vsel %vm1775_vm4, %v527_v6, %v528_v5  ;;  %v446_v41 = vrot.slane %v444_v33, 4  ;;  %v450_v43 = vshll.u32 %v252_v30, 16  ;;  %v1440_v50 = vrot.slane %v1953_v60, 9 }
  0x44   : > { %v1986_v38 = vcombine.low %v526_v0, %v529_v15  ;;  %v437_v39 = vor.u32 %v436_v35, %v433_v34  ;;  %v429_v46 = vsel %vm1811_vm5, %v424_v3, %v428_v22  ;;  %v442_v49 = vrot.slane %v440_v16, 5  ;;  %v2025_v34 = vld [vmem:[%s1729_s25 + $0x6c] sm:$0xf]  ;;  %v2032_v15 = vld [vmem:[%s1729_s25 + $0x70] sm:$0xf] }
  0x45   : > { %v532_v51 = vrot.slane %v1969_v8, 5  ;;  %v2002_v56 = vcombine.low %v419_v24, %v429_v46  ;;  %v452_v59 = vrot.slane %v450_v43, 5  ;;  %v535_v12 = vrot.slane %v252_v30, 5 }
  0x46   : > { %716 = vrot.lane.b32.xlu0 %v1770_v21, %s1662_s26  ;;  %v438_v57 = vrot.slane %v437_v39, 4  ;;  %v447_v63 = vor.u32 %v446_v41, %v442_v49  ;;  %v538_v19 = vshrl.u32 %v1989_v20, 16  ;;  %v405_v22 = vsel %vm1811_vm5, %v400_v32, %v1943_v52 }
  0x47   : > { %718 = vrot.lane.b32.xlu1 %v1906_v1, %s1662_s26  ;;  %v533_v2 = vsel %vm1775_vm4, %v1440_v50, %v532_v51  ;;  %v534_v13 = vrot.slane %v532_v51, 4  ;;  %v541_v25 = vshll.u32 %v1989_v20, 16  ;;  %v551_v26 = vshrl.u32 %v1998_v54, 16 }
  0x48   : > { %v443_v5 = vsel %vm1811_vm5, %v438_v57, %v442_v49  ;;  %v448_v28 = vrot.slane %v447_v63, 4  ;;  %v540_v0 = vrot.slane %v538_v19, 4  ;;  %v547_v6 = vshll.u32 %v1998_v54, 16  ;;  %v258_v63 = vld [vmem:[%s1729_s25 + $0x74] sm:$0x1] }
  0x49   : > { %v536_v18 = vsel %vm1775_vm4, %v534_v13, %v535_v12  ;;  %v543_v30 = vrot.slane %v541_v25, 5  ;;  %v553_v32 = vrot.slane %v551_v26, 4  ;;  %v557_v33 = vshll.u32 %v255_v7, 16 }
  0x4a   : > { %735 = vrot.lane.b32.xlu0 %v1885_v9, %s1667_s8  ;;  %v2022_v52 = vcombine.low %v533_v2, %v536_v18  ;;  %v453_v9 = vsel %vm1811_vm5, %v448_v28, %v452_v59  ;;  %v549_v35 = vrot.slane %v547_v6, 5  ;;  %v1441_v24 = vrot.slane %v1989_v20, 9 }
  0x4b   : > { %737 = vrot.lane.b32.xlu1 %v1949_v55, %s1667_s8  ;;  %v566_v3 = vrot.slane %v1998_v54, 5  ;;  %v2034_v16 = vcombine.low %v443_v5, %v453_v9  ;;  %v544_v39 = vor.u32 %v543_v30, %v540_v0  ;;  %v559_v41 = vrot.slane %v557_v33, 5 }
  0x4c   : > { %v569_v43 = vrot.slane %v255_v7, 5  ;;  %v554_v46 = vor.u32 %v553_v32, %v549_v35  ;;  %v572_v51 = vshrl.u32 %v2025_v34, 16  ;;  %v1456_v57 = vcombine.low %v395_v11, %v405_v22 }
  0x4d   : > { %v567_v49 = vsel %vm1775_vm4, %v1441_v24, %v566_v3  ;;  %v568_v50 = vrot.slane %v566_v3, 4  ;;  %v545_v59 = vrot.slane %v544_v39, 4  ;;  %v575_v12 = vshll.u32 %v2025_v34, 16  ;;  %v1621_v39 = vld [vmem:[%s2342_s1 + $0x10] ss:$0 sps:$4 sm:$0x33]  }
  0x4e   : > { %754 = vrot.lane.b32.xlu0 %v1921_v37, %s1664_s28  ;;  %v585_v37 = vshrl.u32 %v2032_v15, 16  ;;  %v555_v2 = vrot.slane %v554_v46, 4  ;;  %v574_v19 = vrot.slane %v572_v51, 4  ;;  %v581_v7 = vshll.u32 %v2032_v15, 16  ;;  %1557 = vmatprep.subr.msk.bf16.mxu0 %vm1004_vm6, %v1621_v39 }
  0x4f   : > { %756 = vrot.lane.b32.xlu1 %v1936_v47, %s1664_s28  ;;  %v570_v13 = vsel %vm1775_vm4, %v568_v50, %v569_v43  ;;  %v550_v5 = vsel %vm1811_vm5, %v545_v59, %v549_v35  ;;  %v577_v44 = vrot.slane %v575_v12, 5  ;;  %v591_v26 = vshll.u32 %v258_v63, 16  ;;  %1558 = vmatprep.subr.msk.bf16.mxu1 %vm1004_vm6, %v1621_v39 }
  0x50   : > { %v2056_v25 = vcombine.low %v567_v49, %v570_v13  ;;  %v587_v48 = vrot.slane %v585_v37, 4  ;;  %v560_v11 = vsel %vm1811_vm5, %v555_v2, %v559_v41  ;;  %v583_v22 = vrot.slane %v581_v7, 5 }
  0x51   : > { %v1442_v28 = vrot.slane %v2025_v34, 9  ;;  %v2065_v18 = vcombine.low %v550_v5, %v560_v11  ;;  %v578_v0 = vor.u32 %v577_v44, %v574_v19  ;;  %v600_v6 = vrot.slane %v2032_v15, 5 }
  0x52   : > { %773 = vrot.lane.b32.xlu0 %v1906_v1, %s1663_s27  ;;  %v603_v30 = vrot.slane %v258_v63, 5  ;;  %v588_v32 = vor.u32 %v587_v48, %v583_v22  ;;  %v593_v33 = vrot.slane %v591_v26, 5  ;;  %v1443_v9 = vcombine.low %v1781_v27, %v1785_v29 }
  0x53   : > { %775 = vrot.lane.b32.xlu1 %v1927_v42, %s1663_s27  ;;  %v579_v35 = vrot.slane %v578_v0, 4  ;;  %v2072_v24 = vsel %vm1775_vm4, %v1442_v28, %v600_v6  ;;  %v602_v3 = vrot.slane %v600_v6, 4  ;;  %v519_v43 = vsel %vm1775_vm4, %v1438_v14, %v518_v45 }
  0x54   : > { %v589_v41 = vrot.slane %v588_v32, 4  ;;  %v522_v46 = vsel %vm1775_vm4, %v1960_v62, %v521_v53  ;;  %v1006_v45 = vsel %vm1004_vm6, %v1621_v39, 0  ;;  %v2109_v23 = vcombine.low %v1909_v36, %v1917_v40 }
  0x55   : > { %v584_v49 = vsel %vm1811_vm5, %v579_v35, %v583_v22  ;;  %v604_v50 = vsel %vm1775_vm4, %v602_v3, %v603_v30  ;;  %v1464_v31 = vcombine.low %v519_v43, %v522_v46  ;;  %1534 = vmatpush3.bf16.msra.mxu0 %v1006_v45  ;;  %1556 = vmatpush3.bf16.msra.mxu1 %v1006_v45 }
  0x56   : > { %792 = vrot.lane.b32.xlu0 %v1949_v55, %s1668_s9  ;;  %v594_v17 = vsel %vm1811_vm5, %v589_v41, %v593_v33  ;;  %v1472_v61 = vcombine.low %v2072_v24, %v604_v50  ;;  %v2123_v58 = vcombine.low %v1953_v60, %v1969_v8  ;;  %v1467_v36 = vcombine.low %v1989_v20, %v1998_v54 }
  0x57   : > { %794 = vrot.lane.b32.xlu1 %v1456_v57, %s1668_s9  ;;  %v1471_v51 = vcombine.low %v584_v49, %v594_v17  ;;  %v1470_v14 = vcombine.low %v2025_v34, %v2032_v15 }
  0x5a   : > { %811 = vrot.lane.b32.xlu0 %v1936_v47, %s1669_s10 }
  0x5b   : > { %661 = vrot.lane.b32.xlu1 %v1949_v55, %s1666_s30 }
  0x5e   : > { %813 = vrot.lane.b32.xlu0 %v1464_v31, %s1669_s10 }
  0x5f   : > { %663 = vrot.lane.b32.xlu1 %v1456_v57, %s1666_s30 }
  0x62   : > { %701 = vrot.lane.b32.xlu0 %v1936_v47, %s1665_s29 }
  0x63   : > { %703 = vrot.lane.b32.xlu1 %v1464_v31, %s1665_s29 }
  0x66   : > { %720 = vrot.lane.b32.xlu0 %v1927_v42, %s1662_s26 }
  0x67   : > { %722 = vrot.lane.b32.xlu1 %v2109_v23, %s1662_s26 }
  0x6a   : > { %739 = vrot.lane.b32.xlu0 %v1456_v57, %s1667_s8 }
  0x6b   : > { %741 = vrot.lane.b32.xlu1 %v2002_v56, %s1667_s8 }
  0x6e   : > { %758 = vrot.lane.b32.xlu0 %v1464_v31, %s1664_s28 }
  0x6f   : > { %760 = vrot.lane.b32.xlu1 %v1986_v38, %s1664_s28 }
  0x72   : > { %777 = vrot.lane.b32.xlu0 %v2109_v23, %s1663_s27 }
  0x73   : > { %779 = vrot.lane.b32.xlu1 %v2123_v58, %s1663_s27 }
  0x76   : > { %796 = vrot.lane.b32.xlu0 %v2002_v56, %s1668_s9 }
  0x77   : > { %798 = vrot.lane.b32.xlu1 %v2034_v16, %s1668_s9 }
  0x7a   : > { %815 = vrot.lane.b32.xlu0 %v1986_v38, %s1669_s10 }
  0x7b   : > { %665 = vrot.lane.b32.xlu1 %v2002_v56, %s1666_s30 }
  0x7e   : > { %817 = vrot.lane.b32.xlu0 %v2022_v52, %s1669_s10 }
  0x7f   : > { %667 = vrot.lane.b32.xlu1 %v2034_v16, %s1666_s30 }
  0x82   : > { %705 = vrot.lane.b32.xlu0 %v1986_v38, %s1665_s29 }
  0x83   : > { %707 = vrot.lane.b32.xlu1 %v2022_v52, %s1665_s29 }
  0x86   : > { %724 = vrot.lane.b32.xlu0 %v2123_v58, %s1662_s26 }
  0x87   : > { %726 = vrot.lane.b32.xlu1 %v1467_v36, %s1662_s26  ;;  %s2255_s26 = scalar_lea.vmem %s2343_s2, %s1430_s23 }
  0x8a   : > { %743 = vrot.lane.b32.xlu0 %v2034_v16, %s1667_s8 }
  0x8b   : > { %745 = vrot.lane.b32.xlu1 %v2065_v18, %s1667_s8 }
  0x8c   : > { %v715_v40 = vpop.permute.xlu1 %714 }
  0x8d   : > { %v713_v47 = vpop.permute.xlu0 %712 }
  0x8e   : > { %762 = vrot.lane.b32.xlu0 %v2022_v52, %s1664_s28 }
  0x8f   : > { %764 = vrot.lane.b32.xlu1 %v2056_v25, %s1664_s28 }
  0x90   : > { %v772_v53 = vpop.permute.xlu1 %771 }
  0x91   : > { %v770_v55 = vpop.permute.xlu0 %769 }
  0x92   : > { %781 = vrot.lane.b32.xlu0 %v1467_v36, %s1663_s27 }
  0x93   : > { %783 = vrot.lane.b32.xlu1 %v1470_v14, %s1663_s27  ;;  %s1431_s27 = sshll.u32 %s2360_s13, 1 }
  0x94   : > { %s225_s28 = sadd.s32 %s1431_s27, %s2362_s12 }
  0x95   : > { %v751_v60 = vpop.permute.xlu0 %750  ;;  %s1432_s29 = sshll.u32 %s225_s28, 1 }
  0x96   : > { %800 = vrot.lane.b32.xlu0 %v2065_v18, %s1668_s9  ;;  %s227_s5 = scalar_lea.vmem %s2344_s3, %s1432_s29 }
  0x97   : > { %802 = vrot.lane.b32.xlu1 %v1471_v51, %s1668_s9  ;;  %v694_v62 = vpop.permute.xlu1 %693 }
  0x9a   : > { %819 = vrot.lane.b32.xlu0 %v2056_v25, %s1669_s10 }
  0x9b   : > { %821 = vrot.lane.b32.xlu1 %v1472_v61, %s1669_s10  ;;  %v696_v8 = vpop.permute.xlu1 %695 }
  0x9c   : > { %v654_v38 = vpop.permute.xlu0 %653 }
  0x9d   : > { %v826_v20 = vsel %vm823_vm7, %v1443_v9, %v654_v38 }
  0x9e   : > { %v850_v52 = vsel %vm848_vm8, %v826_v20, %v694_v62 }
  0x9f   : > { %v753_v54 = vpop.permute.xlu1 %752  ;;  %v867_v57 = vsel %vm865_vm9, %v850_v52, %v713_v47 }
  0xa0   : > { %v656_v56 = vpop.permute.xlu0 %655 }
  0xa1   : > { %v829_v34 = vsel %vm823_vm7, %v1751_v10, %v656_v56 }
  0xa2   : > { %v852_v15 = vsel %vm848_vm8, %v829_v34, %v696_v8 }
  0xa3   : > { %v869_v16 = vsel %vm865_vm9, %v852_v15, %v715_v40 }
  0xa4   : > { %v732_v59 = vpop.permute.xlu0 %731 }
  0xa5   : > { %v734_v27 = vpop.permute.xlu1 %733  ;;  %v884_v29 = vsel %vm882_vm10, %v867_v57, %v732_v59 }
  0xa6   : > { %v901_v12 = vsel %vm899_vm11, %v884_v29, %v751_v60  ;;  %v886_v37 = vsel %vm882_vm10, %v869_v16, %v734_v27 }
  0xa7   : > { %v918_v2 = vsel %vm916_vm12, %v901_v12, %v770_v55  ;;  %v903_v13 = vsel %vm899_vm11, %v886_v37, %v753_v54 }
  0xa8   : > { %v789_v63 = vpop.permute.xlu0 %788  ;;  %v920_v5 = vsel %vm916_vm12, %v903_v13, %v772_v53 }
  0xa9   : > { %v791_v10 = vpop.permute.xlu1 %790  ;;  %v935_v19 = vsel %vm933_vm13, %v918_v2, %v789_v63 }
  0xaa   : > { %v937_v48 = vsel %vm933_vm13, %v920_v5, %v791_v10 }
  0xac   : > { %v808_v7 = vpop.permute.xlu0 %807 }
  0xad   : > { %v658_v25 = vpop.permute.xlu1 %657  ;;  %v952_v44 = vsel %vm950_vm14, %v935_v19, %v808_v7 }
  0xae   : > { %1535 = vmatprep.mubr.msk.bf16.mxu0 %vm987_vm15, %v952_v44  ;;  %v832_v3 = vsel %vm823_vm7, %v1741_v4, %v658_v25 }
  0xb0   : > { %v810_v11 = vpop.permute.xlu0 %809 }
  0xb1   : > { %v660_v22 = vpop.permute.xlu1 %659  ;;  %v954_v26 = vsel %vm950_vm14, %v937_v48, %v810_v11 }
  0xb2   : > { %1536 = vmatmul.mubr.msk.bf16.vlgmr.msra.gmra.mrb[0].mxu0 %vm987_vm15, %v954_v26  ;;  %v835_v50 = vsel %vm823_vm7, %v1770_v21, %v660_v22 }
  0xb4   : > { %v698_v28 = vpop.permute.xlu0 %697 }
  0xb5   : > { %v700_v18 = vpop.permute.xlu1 %699  ;;  %v854_v39 = vsel %vm848_vm8, %v832_v3, %v698_v28 }
  0xb6   : > { %v856_v61 = vsel %vm848_vm8, %v835_v50, %v700_v18 }
  0xb8   : > { %v717_v0 = vpop.permute.xlu0 %716 }
  0xb9   : > { %v719_v6 = vpop.permute.xlu1 %718  ;;  %v871_v41 = vsel %vm865_vm9, %v854_v39, %v717_v0 }
  0xba   : > { %v873_v45 = vsel %vm865_vm9, %v856_v61, %v719_v6 }
  0xbc   : > { %v736_v30 = vpop.permute.xlu0 %735 }
  0xbd   : > { %v738_v32 = vpop.permute.xlu1 %737  ;;  %v888_v46 = vsel %vm882_vm10, %v871_v41, %v736_v30 }
  0xbe   : > { %v890_v36 = vsel %vm882_vm10, %v873_v45, %v738_v32 }
  0xc0   : > { %v755_v33 = vpop.permute.xlu0 %754 }
  0xc1   : > { %v757_v9 = vpop.permute.xlu1 %756  ;;  %v905_v17 = vsel %vm899_vm11, %v888_v46, %v755_v33 }
  0xc2   : > { %v907_v14 = vsel %vm899_vm11, %v890_v36, %v757_v9 }
  0xc4   : > { %v774_v35 = vpop.permute.xlu0 %773 }
  0xc5   : > { %v776_v24 = vpop.permute.xlu1 %775  ;;  %v922_v51 = vsel %vm916_vm12, %v905_v17, %v774_v35 }
  0xc6   : > { %v924_v21 = vsel %vm916_vm12, %v907_v14, %v776_v24 }
  0xc8   : > { %v793_v43 = vpop.permute.xlu0 %792 }
  0xc9   : > { %v795_v49 = vpop.permute.xlu1 %794  ;;  %v939_v4 = vsel %vm933_vm13, %v922_v51, %v793_v43 }
  0xca   : > { %v941_v53 = vsel %vm933_vm13, %v924_v21, %v795_v49 }
  0xcc   : > { %v812_v31 = vpop.permute.xlu0 %811 }
  0xcd   : > { %v662_v40 = vpop.permute.xlu1 %661  ;;  %v956_v47 = vsel %vm950_vm14, %v939_v4, %v812_v31 }
  0xce   : > { %1539 = vmatprep.mubr.msk.bf16.mxu0 %vm987_vm15, %v956_v47  ;;  %v838_v59 = vsel %vm823_vm7, %v1906_v1, %v662_v40 }
  0xd0   : > { %v814_v55 = vpop.permute.xlu0 %813 }
  0xd1   : > { %v664_v60 = vpop.permute.xlu1 %663  ;;  %v958_v62 = vsel %vm950_vm14, %v941_v53, %v814_v55 }
  0xd2   : > { %1540 = vmatmul.mubr.msk.bf16.gmra.mrb[4].mxu0 %vm987_vm15, %v958_v62  ;;  %v841_v10 = vsel %vm823_vm7, %v1927_v42, %v664_v60 }
  0xd4   : > { %v702_v8 = vpop.permute.xlu0 %701 }
  0xd5   : > { %v704_v38 = vpop.permute.xlu1 %703  ;;  %v858_v27 = vsel %vm848_vm8, %v838_v59, %v702_v8 }
  0xd6   : > { %v860_v13 = vsel %vm848_vm8, %v841_v10, %v704_v38 }
  0xd8   : > { %v721_v20 = vpop.permute.xlu0 %720 }
  0xd9   : > { %v723_v54 = vpop.permute.xlu1 %722  ;;  %v875_v29 = vsel %vm865_vm9, %v858_v27, %v721_v20 }
  0xda   : > { %v877_v7 = vsel %vm865_vm9, %v860_v13, %v723_v54 }
  0xdc   : > { %v740_v56 = vpop.permute.xlu0 %739 }
  0xdd   : > { %v742_v52 = vpop.permute.xlu1 %741  ;;  %v892_v37 = vsel %vm882_vm10, %v875_v29, %v740_v56 }
  0xde   : > { %v894_v25 = vsel %vm882_vm10, %v877_v7, %v742_v52 }
  0xe0   : > { %v759_v34 = vpop.permute.xlu0 %758 }
  0xe1   : > { %v761_v15 = vpop.permute.xlu1 %760  ;;  %v909_v2 = vsel %vm899_vm11, %v892_v37, %v759_v34 }
  0xe2   : > { %v911_v11 = vsel %vm899_vm11, %v894_v25, %v761_v15 }
  0xe4   : > { %v778_v16 = vpop.permute.xlu0 %777 }
  0xe5   : > { %v780_v57 = vpop.permute.xlu1 %779  ;;  %v926_v19 = vsel %vm916_vm12, %v909_v2, %v778_v16 }
  0xe6   : > { %v928_v42 = vsel %vm916_vm12, %v911_v11, %v780_v57 }
  0xe8   : > { %v797_v12 = vpop.permute.xlu0 %796 }
  0xe9   : > { %v799_v63 = vpop.permute.xlu1 %798  ;;  %v943_v1 = vsel %vm933_vm13, %v926_v19, %v797_v12 }
  0xea   : > { %v945_v22 = vsel %vm933_vm13, %v928_v42, %v799_v63 }
  0xec   : > { %v816_v5 = vpop.permute.xlu0 %815 }
  0xed   : > { %v666_v44 = vpop.permute.xlu1 %665  ;;  %v960_v48 = vsel %vm950_vm14, %v943_v1, %v816_v5 }
  0xee   : > { %1543 = vmatprep.mubr.msk.bf16.mxu1 %vm987_vm15, %v960_v48  ;;  %v844_v41 = vsel %vm823_vm7, %v2109_v23, %v666_v44 }
  0xf0   : > { %v818_v26 = vpop.permute.xlu0 %817 }
  0xf1   : > { %v668_v28 = vpop.permute.xlu1 %667  ;;  %v962_v18 = vsel %vm950_vm14, %v945_v22, %v818_v26 }
  0xf2   : > { %1544 = vmatmul.mubr.msk.bf16.vlgmr.msra.gmra.mrb[0].mxu1 %vm987_vm15, %v962_v18  ;;  %v847_v43 = vsel %vm823_vm7, %v2123_v58, %v668_v28 }
  0xf4   : > { %v706_v0 = vpop.permute.xlu0 %705 }
  0xf5   : > { %v708_v6 = vpop.permute.xlu1 %707  ;;  %v862_v46 = vsel %vm848_vm8, %v844_v41, %v706_v0 }
  0xf6   : > { %v864_v49 = vsel %vm848_vm8, %v847_v43, %v708_v6 }
  0xf8   : > { %v725_v30 = vpop.permute.xlu0 %724 }
  0xf9   : > { %v727_v32 = vpop.permute.xlu1 %726  ;;  %v879_v50 = vsel %vm865_vm9, %v862_v46, %v725_v30 }
  0xfa   : > { %v881_v61 = vsel %vm865_vm9, %v864_v49, %v727_v32 }
  0xfc   : > { %v744_v33 = vpop.permute.xlu0 %743 }
  0xfd   : > { %v746_v9 = vpop.permute.xlu1 %745  ;;  %v896_v51 = vsel %vm882_vm10, %v879_v50, %v744_v33 }
  0xfe   : > { %v898_v4 = vsel %vm882_vm10, %v881_v61, %v746_v9 }
 0x100   : > { %v763_v35 = vpop.permute.xlu0 %762 }
 0x101   : > { %v765_v24 = vpop.permute.xlu1 %764  ;;  %v913_v23 = vsel %vm899_vm11, %v896_v51, %v763_v35 }
 0x102   : > { %v915_v58 = vsel %vm899_vm11, %v898_v4, %v765_v24 }
 0x104   : > { %v782_v3 = vpop.permute.xlu0 %781 }
 0x105   : > { %v784_v39 = vpop.permute.xlu1 %783  ;;  %v930_v31 = vsel %vm916_vm12, %v913_v23, %v782_v3 }
 0x106   : > { %v932_v36 = vsel %vm916_vm12, %v915_v58, %v784_v39 }
 0x108   : > { %v801_v17 = vpop.permute.xlu0 %800 }
 0x109   : > { %v803_v45 = vpop.permute.xlu1 %802  ;;  %v947_v40 = vsel %vm933_vm13, %v930_v31, %v801_v17 }
 0x10a   : > { %v949_v14 = vsel %vm933_vm13, %v932_v36, %v803_v45 }
 0x10c   : > { %v820_v47 = vpop.permute.xlu0 %819 }
 0x10d   : > { %v822_v21 = vpop.permute.xlu1 %821  ;;  %v964_v53 = vsel %vm950_vm14, %v947_v40, %v820_v47 }
 0x10e   : > { %v966_v55 = vsel %vm950_vm14, %v949_v14, %v822_v21  ;;  %1547 = vmatprep.mubr.msk.bf16.mxu1 %vm987_vm15, %v964_v53 }
 0x10f   : > { %1548 = vmatmul.mubr.msk.bf16.gmra.mrb[4].mxu1 %vm987_vm15, %v966_v55 }
 0x185   : > { %v1537_v60 = vpop.f32.mrb[0].mxu0 }
 0x186   : > { %v1504_v62 = vpack.c.bf16 %v1537_v60, %v1537_v60  ;;  %v1042_v8 = vpop.f32.mrb[1].mxu0  ;;  %v1225_v56 = vmul.f32 %v1537_v60, %v1537_v60  ;;  %v1189_v29 = vsel %vm823_vm7, %v1537_v60, 0.0 }
 0x187   : > { %v1502_v38 = vpack.c.bf16 %v1042_v8, %v1042_v8  ;;  %v1223_v20 = vmul.f32 %v1042_v8, %v1042_v8  ;;  %v1538_v54 = vpop.f32.mrb[2].mxu0  ;;  %v1186_v15 = vsel %vm823_vm7, %v1042_v8, 0.0 }
 0x188   : > { %1172 = vst.msk [vmem:[%s2255_s26 + $0x8] sm:$0xf] %vm1169_vm0, %v1504_v62  ;;  %v1505_v52 = vpack.c.bf16 %v1538_v54, %v1538_v54  ;;  %v1045_v34 = vpop.f32.mrb[3].mxu0  ;;  %v1226_v37 = vmul.f32 %v1538_v54, %v1538_v54  ;;  %v1242_v13 = vsel %vm823_vm7, %v1225_v56, 0.0  ;;  %v1191_v19 = vsel %vm823_vm7, %v1538_v54, 0.0 }
 0x189   : > { %1170 = vst.msk [vmem:[%s2255_s26] sm:$0xf] %vm1169_vm0, %v1502_v38  ;;  %v1503_v16 = vpack.c.bf16 %v1045_v34, %v1045_v34  ;;  %v1187_v57 = vsel %vm823_vm7, %v1045_v34, 0.0  ;;  %v1224_v59 = vmul.f32 %v1045_v34, %v1045_v34  ;;  %v1239_v12 = vsel %vm823_vm7, %v1223_v20, 0.0 }
 0x18a   : > { %1173 = vst.msk [vmem:[%s2255_s26 + $0xc] sm:$0xf] %vm1169_vm0, %v1505_v52  ;;  %v1188_v27 = vadd.f32 %v1187_v57, %v1186_v15  ;;  %v1244_v5 = vsel %vm823_vm7, %v1226_v37, 0.0 }
 0x18b   : > { %1171 = vst.msk [vmem:[%s2255_s26 + $0x4] sm:$0xf] %vm1169_vm0, %v1503_v16  ;;  %v1240_v63 = vsel %vm823_vm7, %v1224_v59, 0.0 }
 0x18c   : > { %v1190_v10 = vadd.f32 %v1189_v29, %v1188_v27  ;;  %v1241_v2 = vadd.f32 %v1240_v63, %v1239_v12 }
 0x18e   : > { %v1243_v7 = vadd.f32 %v1242_v13, %v1241_v2  ;;  %v1192_v1 = vadd.f32 %v1191_v19, %v1190_v10 }
 0x190   : > { %v1245_v25 = vadd.f32 %v1244_v5, %v1243_v7 }
 0x1a5   : > { %v1541_v44 = vpop.f32.mrb[4].mxu0 }
 0x1a6   : > { %v1508_v48 = vpack.c.bf16 %v1541_v44, %v1541_v44  ;;  %v1058_v11 = vpop.f32.mrb[5].mxu0  ;;  %v1229_v9 = vmul.f32 %v1541_v44, %v1541_v44  ;;  %v1197_v39 = vsel %vm823_vm7, %v1541_v44, 0.0 }
 0x1a7   : > { %v1506_v42 = vpack.c.bf16 %v1058_v11, %v1058_v11  ;;  %v1193_v22 = vsel %vm823_vm7, %v1058_v11, 0.0  ;;  %v1227_v26 = vmul.f32 %v1058_v11, %v1058_v11  ;;  %v1542_v28 = vpop.f32.mrb[6].mxu0 }
 0x1a8   : > { %1176 = vst.msk [vmem:[%s2255_s26 + $0x18] sm:$0xf] %vm1169_vm0, %v1508_v48  ;;  %v1194_v18 = vadd.f32 %v1193_v22, %v1192_v1  ;;  %v1509_v0 = vpack.c.bf16 %v1542_v28, %v1542_v28  ;;  %v1061_v6 = vpop.f32.mrb[7].mxu0  ;;  %v1230_v41 = vmul.f32 %v1542_v28, %v1542_v28  ;;  %v1199_v49 = vsel %vm823_vm7, %v1542_v28, 0.0 }
 0x1a9   : > { %1174 = vst.msk [vmem:[%s2255_s26 + $0x10] sm:$0xf] %vm1169_vm0, %v1506_v42  ;;  %v1246_v30 = vsel %vm823_vm7, %v1227_v26, 0.0  ;;  %v1507_v32 = vpack.c.bf16 %v1061_v6, %v1061_v6  ;;  %v1195_v33 = vsel %vm823_vm7, %v1061_v6, 0.0  ;;  %v1228_v3 = vmul.f32 %v1061_v6, %v1061_v6 }
 0x1aa   : > { %v1247_v35 = vadd.f32 %v1246_v30, %v1245_v25  ;;  %1177 = vst.msk [vmem:[%s2255_s26 + $0x1c] sm:$0xf] %vm1169_vm0, %v1509_v0  ;;  %v1196_v24 = vadd.f32 %v1195_v33, %v1194_v18  ;;  %v1250_v17 = vsel %vm823_vm7, %v1229_v9, 0.0  ;;  %v1252_v45 = vsel %vm823_vm7, %v1230_v41, 0.0 }
 0x1ab   : > { %1175 = vst.msk [vmem:[%s2255_s26 + $0x14] sm:$0xf] %vm1169_vm0, %v1507_v32  ;;  %v1248_v46 = vsel %vm823_vm7, %v1228_v3, 0.0 }
 0x1ac   : > { %v1198_v43 = vadd.f32 %v1197_v39, %v1196_v24  ;;  %v1249_v50 = vadd.f32 %v1248_v46, %v1247_v35 }
 0x1ae   : > { %v1200_v61 = vadd.f32 %v1199_v49, %v1198_v43  ;;  %v1251_v51 = vadd.f32 %v1250_v17, %v1249_v50 }
 0x1b0   : > { %v1253_v4 = vadd.f32 %v1252_v45, %v1251_v51 }
 0x1c5   : > { %v1545_v23 = vpop.f32.mrb[0].mxu1 }
 0x1c6   : > { %v1512_v58 = vpack.c.bf16 %v1545_v23, %v1545_v23  ;;  %v1074_v31 = vpop.f32.mrb[1].mxu1  ;;  %v1233_v38 = vmul.f32 %v1545_v23, %v1545_v23  ;;  %v1205_v52 = vsel %vm823_vm7, %v1545_v23, 0.0 }
 0x1c7   : > { %v1510_v36 = vpack.c.bf16 %v1074_v31, %v1074_v31  ;;  %v1201_v40 = vsel %vm823_vm7, %v1074_v31, 0.0  ;;  %v1231_v47 = vmul.f32 %v1074_v31, %v1074_v31  ;;  %v1546_v14 = vpop.f32.mrb[2].mxu1 }
 0x1c8   : > { %1180 = vst.msk [vmem:[%s2255_s26 + $0x28] sm:$0xf] %vm1169_vm0, %v1512_v58  ;;  %v1202_v21 = vadd.f32 %v1201_v40, %v1200_v61  ;;  %v1513_v53 = vpack.c.bf16 %v1546_v14, %v1546_v14  ;;  %v1077_v55 = vpop.f32.mrb[3].mxu1  ;;  %v1234_v34 = vmul.f32 %v1546_v14, %v1546_v14  ;;  %v1207_v57 = vsel %vm823_vm7, %v1546_v14, 0.0 }
 0x1c9   : > { %1178 = vst.msk [vmem:[%s2255_s26 + $0x20] sm:$0xf] %vm1169_vm0, %v1510_v36  ;;  %v1254_v60 = vsel %vm823_vm7, %v1231_v47, 0.0  ;;  %v1511_v62 = vpack.c.bf16 %v1077_v55, %v1077_v55  ;;  %v1203_v8 = vsel %vm823_vm7, %v1077_v55, 0.0  ;;  %v1232_v56 = vmul.f32 %v1077_v55, %v1077_v55 }
 0x1ca   : > { %v1255_v20 = vadd.f32 %v1254_v60, %v1253_v4  ;;  %1181 = vst.msk [vmem:[%s2255_s26 + $0x2c] sm:$0xf] %vm1169_vm0, %v1513_v53  ;;  %v1204_v54 = vadd.f32 %v1203_v8, %v1202_v21  ;;  %v1258_v27 = vsel %vm823_vm7, %v1233_v38, 0.0  ;;  %v1260_v37 = vsel %vm823_vm7, %v1234_v34, 0.0 }
 0x1cb   : > { %1179 = vst.msk [vmem:[%s2255_s26 + $0x24] sm:$0xf] %vm1169_vm0, %v1511_v62  ;;  %v1256_v16 = vsel %vm823_vm7, %v1232_v56, 0.0 }
 0x1cc   : > { %v1206_v15 = vadd.f32 %v1205_v52, %v1204_v54  ;;  %v1257_v59 = vadd.f32 %v1256_v16, %v1255_v20 }
 0x1ce   : > { %v1208_v29 = vadd.f32 %v1207_v57, %v1206_v15  ;;  %v1259_v12 = vadd.f32 %v1258_v27, %v1257_v59 }
 0x1d0   : > { %v1261_v63 = vadd.f32 %v1260_v37, %v1259_v12 }
 0x1e2   : > { %v1549_v10 = vpop.f32.mrb[4].mxu1 }
 0x1e3   : > { %v1516_v2 = vpack.c.bf16 %v1549_v10, %v1549_v10  ;;  %v1090_v13 = vpop.f32.mrb[5].mxu1  ;;  %v1237_v26 = vmul.f32 %v1549_v10, %v1549_v10  ;;  %v1213_v6 = vsel %vm823_vm7, %v1549_v10, 0.0 }
 0x1e4   : > { %v1514_v19 = vpack.c.bf16 %v1090_v13, %v1090_v13  ;;  %v1209_v7 = vsel %vm823_vm7, %v1090_v13, 0.0  ;;  %v1235_v1 = vmul.f32 %v1090_v13, %v1090_v13  ;;  %v1550_v5 = vpop.f32.mrb[6].mxu1 }
 0x1e5   : > { %1184 = vst.msk [vmem:[%s2255_s26 + $0x38] sm:$0xf] %vm1169_vm0, %v1516_v2  ;;  %v1210_v25 = vadd.f32 %v1209_v7, %v1208_v29  ;;  %v1517_v44 = vpack.c.bf16 %v1550_v5, %v1550_v5  ;;  %v1093_v48 = vpop.f32.mrb[7].mxu1  ;;  %v1238_v30 = vmul.f32 %v1550_v5, %v1550_v5  ;;  %v1215_v9 = vsel %vm823_vm7, %v1550_v5, 0.0 }
 0x1e6   : > { %1182 = vst.msk [vmem:[%s2255_s26 + $0x30] sm:$0xf] %vm1169_vm0, %v1514_v19  ;;  %v1262_v11 = vsel %vm823_vm7, %v1235_v1, 0.0  ;;  %v1515_v42 = vpack.c.bf16 %v1093_v48, %v1093_v48  ;;  %v1211_v22 = vsel %vm823_vm7, %v1093_v48, 0.0  ;;  %v1236_v0 = vmul.f32 %v1093_v48, %v1093_v48 }
 0x1e7   : > { %v1263_v28 = vadd.f32 %v1262_v11, %v1261_v63  ;;  %1185 = vst.msk [vmem:[%s2255_s26 + $0x3c] sm:$0xf] %vm1169_vm0, %v1517_v44  ;;  %v1212_v18 = vadd.f32 %v1211_v22, %v1210_v25  ;;  %v1266_v24 = vsel %vm823_vm7, %v1237_v26, 0.0  ;;  %v1268_v41 = vsel %vm823_vm7, %v1238_v30, 0.0 }
 0x1e8   : > { %1183 = vst.msk [vmem:[%s2255_s26 + $0x34] sm:$0xf] %vm1169_vm0, %v1515_v42  ;;  %v1264_v33 = vsel %vm823_vm7, %v1236_v0, 0.0 }
 0x1e9   : > { %v1214_v32 = vadd.f32 %v1213_v6, %v1212_v18  ;;  %v1265_v35 = vadd.f32 %v1264_v33, %v1263_v28 }
 0x1eb   : > { %v1216_v3 = vadd.f32 %v1215_v9, %v1214_v32  ;;  %v1267_v39 = vadd.f32 %v1266_v24, %v1265_v35 }
 0x1ed   : > { %v1217_v43 = vrot.slane %v1216_v3, 4  ;;  %v1269_v46 = vadd.f32 %v1268_v41, %v1267_v39 }
 0x1ef   : > { %v1218_v49 = vadd.f32 %v1217_v43, %v1216_v3  ;;  %v1270_v50 = vrot.slane %v1269_v46, 4 }
 0x1f1   : > { %v1219_v17 = vrot.slane %v1218_v49, 2  ;;  %v1271_v61 = vadd.f32 %v1270_v50, %v1269_v46 }
 0x1f3   : > { %v1220_v51 = vadd.f32 %v1219_v17, %v1218_v49  ;;  %v1272_v45 = vrot.slane %v1271_v61, 2 }
 0x1f5   : > { %v1221_v4 = vrot.slane %v1220_v51, 1  ;;  %v1273_v23 = vadd.f32 %v1272_v45, %v1271_v61 }
 0x1f7   : > { %v1274_v58 = vrot.slane %v1273_v23, 1  ;;  %v1222_v31 = vadd.f32 %v1221_v4, %v1220_v51 }
 0x1f9   : > { %v1275_v36 = vadd.f32 %v1274_v58, %v1273_v23 }
 0x1fb   : > { %v1277_v40 = vsel %vm1276_vm1, %v1222_v31, %v1275_v36 }
 0x1fc   : > { %1279 = vst.msk [vmem:[%s227_s5] sm:$0x3] %vm1278_vm2, %v1277_v40 }
 0x1fd PF: > { %s14_s16 = sadd.s32 1, %s1660_s16   ;;  %s2349_s12 = smov %s1652_s14 }
 0x1fe   : > { %p11_p7 = scmp.ge.s32.totalorder %s14_s16, 6   ;;  %s2350_s13 = smov %s1656_s15 }
 0x1ff   : > { %s2351_s14 = smov %s2354_s17  ;;  %s2352_s15 = smov %s2358_s18 }
 0x200   :  { %13 = sbr.rel (!%p11_p7) target bundleno = 3 (0x3), region = 70 }

// kernel: residual_block.4
= control target key start
LH: loop header
LB: loop body
LE: loop exit
PB: predicated region body
PF: predicated region fallthrough
CT: control target
= control target key end

     0   :  { %s1775_s21 = smov 0   ;;  %s1777_s22 = smov 0   ;;  %s2434_s0 = inlined_call_operand.vmem [shape: bf16[2,2,10,18,4], index: 0, kind: input, shape index: {}]   ;;  %s2435_s1 = inlined_call_operand.vmem [shape: f32[1,4], index: 1, kind: input, shape index: {}]   ;;  %s2436_s2 = inlined_call_operand.vmem [shape: f32[1,4], index: 2, kind: input, shape index: {}]   ;;  %s2437_s3 = inlined_call_operand.vmem [shape: f32[1,4], index: 3, kind: input, shape index: {}]   ;;  %s2438_s4 = inlined_call_operand.vmem [shape: bf16[36,4], index: 4, kind: input, shape index: {}]   ;;  %s2439_s5 = inlined_call_operand.vmem [shape: bf16[2,2,128,4], index: 5, kind: output, shape index: {0}]   ;;  %s2440_s6 = inlined_call_operand.vmem [shape: f32[2,2,2,4], index: 6, kind: output, shape index: {1}]  }
   0x1   :  { %s1779_s23 = smov 0   ;;  %s1781_s24 = smov 0  }
   0x2   :  { %s1783_s25 = smov 0  }
   0x3 LB: > { %s26_s26 = sadd.s32 1, %s1722_s23  ;;  %s29_s27 = sadd.s32 1, %s1726_s24  ;;  %s1730_s25 = sphi %s1783_s25, %s17_s25   ;;  %s1726_s24 = sphi %s1781_s24, %s2452_s24   ;;  %s1722_s23 = sphi %s1779_s23, %s2451_s23   ;;  %s1718_s22 = sphi %s1777_s22, %s2450_s22   ;;  %s1714_s21 = sphi %s1775_s21, %s2449_s21  }
   0x4   : > { %p27_p0 = scmp.ge.s32.totalorder %s26_s26, 2  ;;  %p1519_p1 = scmp.ge.s32.totalorder %s1730_s25, 1 }
   0x5   : > { %p237_p2 = scmp.lt.s32.totalorder %s1730_s25, 5 }
   0x6   : > { %s2454_s26 = smov (%p27_p0, %s26_s26), 0  ;;  %s2456_s27 = smov (!%p27_p0, %s29_s27), %s1726_s24 }
   0x7   : > { %p238_p3 = pnand %p1519_p1, %p237_p2  ;;  %p31_p4 = scmp.ge.s32.totalorder %s2456_s27, 2 }
   0x8   : > { %p283_p5 = scmp.lt.s32.totalorder (!%p238_p3), %s1718_s22, 1  ;;  %p285_p6 = scmp.lt.s32.totalorder (!%p238_p3), %s1714_s21, 1  ;;  %v541_v0 = vlaneseq (!%p238_p3)  ;;  %v1827_v2 = vld [vmem:[%s2435_s1] ss:$0 sm:$0xff] (!%p238_p3)  ;;  %vm737_vm8 = vcmask (!%p238_p3), 1046528  }
   0x9   : > { %s2458_s27 = smov (%p31_p4, %s2456_s27), 0  ;;  %241 = sbr.rel (%p238_p3) target bundleno = 523 (0x20b), region = 40 }
   0xa   : > { %v1817_v1 = vshrl.u32 (!%p238_p3), %v541_v0, 7  ;;  %v1841_v13 = vld [vmem:[%s2436_s2] ss:$0 sm:$0xff] (!%p238_p3)  ;;  %p554_p7 = scmp.gt.s32.totalorder (!%p238_p3), %s1714_s21, 0  ;;  %s1732_s19 = smov (!%p238_p3), 12  }
   0xb   : > { %v1851_v23 = vld [vmem:[%s2437_s3] ss:$0 sm:$0xff] (!%p238_p3)  ;;  %s1733_s20 = smov (!%p238_p3), 24   ;;  %s1736_s12 = smov (!%p238_p3), 32  }
   0xc   : > { %vm545_vm0 = vcmp.ge.s32.totalorder (!%p238_p3), %v1817_v1, 1  ;;  %v1834_v6 = vadd.s32 (!%p238_p3), 16, %v1817_v1  ;;  %s1737_s13 = smov (!%p238_p3), 4   ;;  %s1738_s14 = smov (!%p238_p3), 16  }
   0xd   : > { %s1739_s15 = smov (!%p238_p3), 28  }
   0xe   : > { %vm550_vm1 = vcmp.le.s32.totalorder (!%p238_p3), %v1834_v6, 16  ;;  %v1691_v6 = vld [vmem:[%s2438_s4 + $0x10] ss:$0 sps:$4 sm:$0x33] (!%p238_p3)  }
  0x10   : > { %s2460_s22 = smov (!%p283_p5, %s1718_s22), 1 }
  0x11   : > { %s1813_s28 = scalar_select %p285_p6, %s1714_s21, 1 }
  0x12   : > { %s1640_s29 = smul.u32 60, %s2460_s22 }
  0x13   : > { %s1639_s30 = smul.u32 30, %s1813_s28  ;;  %s1521_s17 = sshll.u32 %s1813_s28, 4 }
  0x14   : > { %s555_s18 = scalar_select %p554_p7, 1, 0 }
  0x15   : > { %s289_s7 = sadd.s32 %s1640_s29, %s1639_s30  ;;  %s1734_s29 = smov 20  }
  0x16   : > { %s1520_s8 = sshll.u32 %s289_s7, 2  ;;  %v556_v0 = vstv %s555_s18  ;;  %s1735_s30 = smov 8  }
  0x17   : > { %s1822_s11 = scalar_lea.vmem %s2434_s0, %s1520_s8  ;;  %vm1902_vm11 = vcmp.eq.s32.totalorder %v556_v0, 1  ;;  %s1522_s18 = sshll.u32 %s2460_s22, 5 }
  0x18   : > { %v1594_v3 = vld [vmem:[%s1822_s11 + $0x18] sm:$0xff]   ;;  %v313_v4 = vld [vmem:[%s1822_s11 + $0xc] sm:$0xff]   ;;  %v319_v5 = vld [vmem:[%s1822_s11 + $0x24] sm:$0xff]   ;;  %s2106_s16 = scalar_select %p285_p6, 1, 0 }
  0x19   : > { %v1580_v7 = vunpack.c.l.bf16 %v1594_v3  ;;  %v1581_v8 = vunpack.c.h.bf16 %v1594_v3  ;;  %v343_v9 = vunpack.c.l.bf16 %v313_v4  ;;  %v344_v10 = vunpack.c.h.bf16 %v313_v4  ;;  %v315_v11 = vld [vmem:[%s1822_s11 + $0x14] sm:$0x1]  ;;  %v1575_v12 = vld [vmem:[%s1822_s11] sm:$0xff]   ;;  %v312_v22 = vld [vmem:[%s1822_s11 + $0x8] sm:$0x1]  ;;  %s1524_s8 = sshll.u32 %s2460_s22, 1 }
  0x1a   : > { %v349_v14 = vunpack.c.l.bf16 %v319_v5  ;;  %v350_v15 = vunpack.c.h.bf16 %v319_v5  ;;  %v345_v16 = vunpack.c.l.bf16 %v315_v11  ;;  %v1576_v17 = vunpack.c.l.bf16 %v1575_v12  ;;  %v318_v3 = vld [vmem:[%s1822_s11 + $0x20] sm:$0x1]  ;;  %vm558_vm14 = vmand %vm545_vm0, %vm1902_vm11  ;;  %s306_s9 = sadd.s32 %s1524_s8, %s1813_s28 }
  0x1b   : > { %v383_v18 = vmul.f32 %v1580_v7, %v1827_v2  ;;  %v384_v19 = vmul.f32 %v1581_v8, %v1827_v2  ;;  %v380_v20 = vmul.f32 %v1827_v2, %v343_v9  ;;  %v381_v21 = vmul.f32 %v1827_v2, %v344_v10  ;;  %vm560_vm15 = vmand %vm550_vm1, %vm1902_vm11  ;;  %s1525_s10 = sshll.u32 %s306_s9, 1 }
  0x1c   : > { %v386_v24 = vmul.f32 %v1827_v2, %v349_v14  ;;  %v387_v25 = vmul.f32 %v1827_v2, %v350_v15  ;;  %v382_v26 = vmul.f32 %v1827_v2, %v345_v16  ;;  %v1577_v27 = vunpack.c.h.bf16 %v1575_v12 }
  0x1d   : > { %v420_v28 = vadd.f32 %v1841_v13, %v383_v18  ;;  %v421_v29 = vadd.f32 %v1841_v13, %v384_v19  ;;  %v417_v30 = vadd.f32 %v1841_v13, %v380_v20  ;;  %v418_v31 = vadd.f32 %v1841_v13, %v381_v21 }
  0x1e   : > { %v423_v32 = vadd.f32 %v1841_v13, %v386_v24  ;;  %v424_v33 = vadd.f32 %v1841_v13, %v387_v25  ;;  %v419_v34 = vadd.f32 %v1841_v13, %v382_v26  ;;  %v342_v35 = vunpack.c.l.bf16 %v312_v22 }
  0x1f   : > { %vm450_vm2 = vcmp.gt.f32.partialorder %v420_v28, 0.0  ;;  %vm451_vm3 = vcmp.gt.f32.partialorder %v421_v29, 0.0  ;;  %v487_v36 = vmul.f32 %v1851_v23, %v420_v28  ;;  %v488_v37 = vmul.f32 %v1851_v23, %v421_v29 }
  0x20   : > { %vm447_vm4 = vcmp.gt.f32.partialorder %v417_v30, 0.0  ;;  %vm448_vm5 = vcmp.gt.f32.partialorder %v418_v31, 0.0  ;;  %v484_v38 = vmul.f32 %v1851_v23, %v417_v30  ;;  %v485_v39 = vmul.f32 %v1851_v23, %v418_v31 }
  0x21   : > { %v517_v40 = vsel %vm450_vm2, %v420_v28, %v487_v36  ;;  %v518_v41 = vsel %vm451_vm3, %v421_v29, %v488_v37  ;;  %vm453_vm6 = vcmp.gt.f32.partialorder %v423_v32, 0.0  ;;  %vm454_vm7 = vcmp.gt.f32.partialorder %v424_v33, 0.0 }
  0x22   : > { %v580_v42 = vsel %vm545_vm0, %v517_v40, 0.0  ;;  %v514_v43 = vsel %vm447_vm4, %v417_v30, %v484_v38  ;;  %v515_v44 = vsel %vm448_vm5, %v418_v31, %v485_v39  ;;  %v490_v45 = vmul.f32 %v1851_v23, %v423_v32 }
  0x23   : > { %v1872_v46 = vpack.c.bf16 %v518_v41, %v580_v42  ;;  %v577_v47 = vsel %vm545_vm0, %v514_v43, 0.0  ;;  %v491_v48 = vmul.f32 %v1851_v23, %v424_v33  ;;  %vm449_vm9 = vcmp.gt.f32.partialorder %v419_v34, 0.0 }
  0x24   : > { %v1879_v49 = vpack.c.bf16 %v515_v44, %v577_v47  ;;  %v520_v50 = vsel %vm453_vm6, %v423_v32, %v490_v45  ;;  %v486_v51 = vmul.f32 %v1851_v23, %v419_v34  ;;  %v377_v52 = vmul.f32 %v1576_v17, %v1827_v2  ;;  %v321_v17 = vld [vmem:[%s1822_s11 + $0x2c] sm:$0x1]  ;;  %v1595_v45 = vld [vmem:[%s1822_s11 + $0x30] sm:$0xff]  }
  0x25   : > { %830 = vrot.lane.b32.xlu1 %v1872_v46, %s1732_s19  ;;  %v521_v53 = vsel %vm454_vm7, %v424_v33, %v491_v48  ;;  %v583_v54 = vsel %vm545_vm0, %v520_v50, 0.0  ;;  %v378_v55 = vmul.f32 %v1577_v27, %v1827_v2  ;;  %v379_v56 = vmul.f32 %v1827_v2, %v342_v35 }
  0x26   : > { %828 = vrot.lane.b32.xlu0 %v1879_v49, %s1732_s19  ;;  %v1892_v57 = vpack.c.bf16 %v521_v53, %v583_v54  ;;  %v516_v58 = vsel %vm449_vm9, %v419_v34, %v486_v51  ;;  %v741_v59 = vrot.slane %v1879_v49, 1  ;;  %v414_v60 = vadd.f32 %v1841_v13, %v377_v52  ;;  %v1689_v52 = vld [vmem:[%s2438_s4] sm:$0xff]  }
  0x27   : > { %v579_v61 = vsel %vm550_vm1, %v516_v58, 0.0  ;;  %v415_v62 = vadd.f32 %v1841_v13, %v378_v55  ;;  %v416_v63 = vadd.f32 %v1841_v13, %v379_v56  ;;  %v348_v12 = vunpack.c.l.bf16 %v318_v3  ;;  %v324_v58 = vld [vmem:[%s1822_s11 + $0x38] sm:$0x1]  ;;  %1609 = vmatprep.subr.bf16.mxu0 %v1689_v52  ;;  %1631 = vmatprep.subr.bf16.mxu1 %v1689_v52 }
  0x28   : > { %v607_v4 = vpack.c.bf16 %v579_v61, %v579_v61  ;;  %vm444_vm10 = vcmp.gt.f32.partialorder %v414_v60, 0.0  ;;  %v481_v5 = vmul.f32 %v1851_v23, %v414_v60  ;;  %v650_v25 = vshrl.u32 %v1872_v46, 16  ;;  %1610 = vmatpush3.bf16.msra.mxu0 %v1689_v52  ;;  %1634 = vmatpush3.bf16.msra.mxu1 %v1689_v52  ;;  %v330_v52 = vld [vmem:[%s1822_s11 + $0x50] sm:$0x1] }
  0x29   : > { %878 = vrot.lane.b32.xlu1 %v1892_v57, %s1733_s20  ;;  %vm445_vm12 = vcmp.gt.f32.partialorder %v415_v62, 0.0  ;;  %vm446_vm13 = vcmp.gt.f32.partialorder %v416_v63, 0.0  ;;  %v482_v8 = vmul.f32 %v1851_v23, %v415_v62  ;;  %v483_v9 = vmul.f32 %v1851_v23, %v416_v63 }
  0x2a   : > { %876 = vrot.lane.b32.xlu0 %v1872_v46, %s1733_s20  ;;  %v742_v10 = vrot.slane %v607_v4, 1  ;;  %v511_v11 = vsel %vm444_vm10, %v414_v60, %v481_v5  ;;  %v385_v21 = vmul.f32 %v1827_v2, %v348_v12  ;;  %v652_v26 = vshll.u32 %v1872_v46, 16 }
  0x2b   : > { %v512_v14 = vsel %vm445_vm12, %v415_v62, %v482_v8  ;;  %v513_v15 = vsel %vm446_vm13, %v416_v63, %v483_v9  ;;  %v574_v16 = vsel %vm558_vm14, %v511_v11, 0.0  ;;  %v640_v28 = vshll.u32 %v1879_v49, 16  ;;  %v325_v63 = vld [vmem:[%s1822_s11 + $0x3c] sm:$0xff]  }
  0x2c   : > { %v743_v18 = vsel %vm737_vm8, %v741_v59, %v742_v10  ;;  %v575_v19 = vsel %vm1902_vm11, %v512_v14, 0.0  ;;  %v576_v20 = vsel %vm560_vm15, %v513_v15, 0.0  ;;  %v422_v27 = vadd.f32 %v1841_v13, %v385_v21  ;;  %v1690_v10 = vld [vmem:[%s2438_s4 + $0x8] sm:$0xff]  }
  0x2d   : > { %v1925_v22 = vpack.c.bf16 %v575_v19, %v574_v16  ;;  %v605_v24 = vpack.c.bf16 %v576_v20, %v576_v20  ;;  %v645_v29 = vshll.u32 %v607_v4, 16  ;;  %v351_v30 = vunpack.c.l.bf16 %v321_v17  ;;  %1611 = vmatprep.subr.bf16.mxu0 %v1690_v10  ;;  %1632 = vmatprep.subr.bf16.mxu1 %v1690_v10 }
  0x2e   : > { %860 = vrot.lane.b32.xlu0 %v743_v18, %s1734_s29  ;;  %vm452_vm2 = vcmp.gt.f32.partialorder %v422_v27, 0.0  ;;  %v489_v35 = vmul.f32 %v1851_v23, %v422_v27  ;;  %v654_v37 = vrot.slane %v652_v26, 1  ;;  %v638_v40 = vshrl.u32 %v1879_v49, 16  ;;  %v327_v26 = vld [vmem:[%s1822_s11 + $0x44] sm:$0x1]  ;;  %1612 = vmatpush3.bf16.msra.mxu0 %v1690_v10 }
  0x2f   : > { %v738_v31 = vrot.slane %v1925_v22, 1  ;;  %v739_v32 = vrot.slane %v605_v24, 1  ;;  %v626_v33 = vshrl.u32 %v1925_v22, 16  ;;  %v628_v34 = vshll.u32 %v1925_v22, 16  ;;  %1635 = vmatpush3.bf16.msra.mxu1 %v1690_v10 }
  0x30   : > { %v633_v36 = vshll.u32 %v605_v24, 16  ;;  %v642_v41 = vrot.slane %v640_v28, 1  ;;  %v519_v42 = vsel %vm452_vm2, %v422_v27, %v489_v35  ;;  %v744_v43 = vrot.slane %v1872_v46, 1 }
  0x31   : > { %v740_v38 = vsel %vm737_vm8, %v738_v31, %v739_v32  ;;  %v630_v39 = vrot.slane %v628_v34, 1  ;;  %vm624_vm3 = vsmask.f32 7424  ;;  %v388_v44 = vmul.f32 %v1827_v2, %v351_v30 }
  0x32   : > { %812 = vrot.lane.b32.xlu1 %v740_v38, %s1735_s30  ;;  %v582_v47 = vsel %vm550_vm1, %v519_v42, 0.0  ;;  %v635_v48 = vrot.slane %v633_v36, 1  ;;  %v655_v50 = vor.u32 %v654_v37, %v650_v25  ;;  %v647_v51 = vrot.slane %v645_v29, 1  ;;  %v1596_v37 = vld [vmem:[%s1822_s11 + $0x48] sm:$0xff]  }
  0x33   : > { %v609_v53 = vpack.c.bf16 %v582_v47, %v582_v47  ;;  %v631_v54 = vor.u32 %v630_v39, %v626_v33  ;;  %v425_v55 = vadd.f32 %v1841_v13, %v388_v44  ;;  %v664_v56 = vshll.u32 %v1892_v57, 16 }
  0x34   : > { %v643_v59 = vor.u32 %v642_v41, %v638_v40  ;;  %v662_v60 = vshrl.u32 %v1892_v57, 16  ;;  %v1584_v61 = vunpack.c.l.bf16 %v1595_v45  ;;  %v1585_v62 = vunpack.c.h.bf16 %v1595_v45 }
  0x35   : > { %v745_v0 = vrot.slane %v609_v53, 1  ;;  %v657_v3 = vshll.u32 %v609_v53, 16  ;;  %vm455_vm4 = vcmp.gt.f32.partialorder %v425_v55, 0.0  ;;  %v492_v4 = vmul.f32 %v1851_v23, %v425_v55 }
  0x36   : > { %814 = vrot.lane.b32.xlu1 %v743_v18, %s1735_s30  ;;  %v666_v5 = vrot.slane %v664_v56, 1  ;;  %v389_v7 = vmul.f32 %v1584_v61, %v1827_v2  ;;  %v390_v8 = vmul.f32 %v1585_v62, %v1827_v2  ;;  %v354_v9 = vunpack.c.l.bf16 %v324_v58 }
  0x37   : > { %v1960_v11 = vsel %vm737_vm8, %v744_v43, %v745_v0  ;;  %v659_v12 = vrot.slane %v657_v3, 1  ;;  %v522_v14 = vsel %vm455_vm4, %v425_v55, %v492_v4  ;;  %v355_v15 = vunpack.c.l.bf16 %v325_v63 }
  0x38   : > { %908 = vrot.lane.b32.xlu0 %v1960_v11, %s1736_s12  ;;  %v636_v16 = vsel %vm624_vm3, %v631_v54, %v635_v48  ;;  %v585_v17 = vsel %vm550_vm1, %v522_v14, 0.0  ;;  %v426_v18 = vadd.f32 %v1841_v13, %v389_v7  ;;  %v427_v19 = vadd.f32 %v1841_v13, %v390_v8  ;;  %v331_v14 = vld [vmem:[%s1822_s11 + $0x54] sm:$0xff]  }
  0x39   : > { %v1972_v20 = vsel %vm624_vm3, %v655_v50, %v659_v12  ;;  %v1974_v21 = vpack.c.bf16 %v585_v17, %v585_v17  ;;  %v391_v24 = vmul.f32 %v1827_v2, %v354_v9  ;;  %v356_v25 = vunpack.c.h.bf16 %v325_v63 }
  0x3a   : > { %862 = vrot.lane.b32.xlu1 %v1960_v11, %s1734_s29  ;;  %vm456_vm5 = vcmp.gt.f32.partialorder %v426_v18, 0.0  ;;  %vm457_vm6 = vcmp.gt.f32.partialorder %v427_v19, 0.0  ;;  %v493_v27 = vmul.f32 %v1851_v23, %v426_v18  ;;  %v494_v28 = vmul.f32 %v1851_v23, %v427_v19 }
  0x3b   : > { %v667_v29 = vor.u32 %v666_v5, %v662_v60  ;;  %v669_v30 = vshll.u32 %v1974_v21, 16  ;;  %v428_v31 = vadd.f32 %v1841_v13, %v391_v24  ;;  %v392_v32 = vmul.f32 %v1827_v2, %v355_v15 }
  0x3c   : > { %796 = vrot.lane.b32.xlu0 %v636_v16, %s1737_s13  ;;  %v648_v33 = vsel %vm624_vm3, %v643_v59, %v647_v51  ;;  %v523_v34 = vsel %vm456_vm5, %v426_v18, %v493_v27  ;;  %v393_v35 = vmul.f32 %v1827_v2, %v356_v25  ;;  %v357_v36 = vunpack.c.l.bf16 %v327_v26 }
  0x3d   : > { %v671_v38 = vrot.slane %v669_v30, 1  ;;  %v524_v39 = vsel %vm457_vm6, %v427_v19, %v494_v28  ;;  %v586_v40 = vsel %vm545_vm0, %v523_v34, 0.0  ;;  %vm458_vm7 = vcmp.gt.f32.partialorder %v428_v31, 0.0  ;;  %v333_v34 = vld [vmem:[%s1822_s11 + $0x5c] sm:$0x1] }
  0x3e   : > { %846 = vrot.lane.b32.xlu1 %v1972_v20, %s1738_s14  ;;  %v495_v41 = vmul.f32 %v1851_v23, %v428_v31  ;;  %v429_v42 = vadd.f32 %v1841_v13, %v392_v32  ;;  %v430_v43 = vadd.f32 %v1841_v13, %v393_v35  ;;  %v394_v45 = vmul.f32 %v1827_v2, %v357_v36  ;;  %v1597_v35 = vld [vmem:[%s1822_s11 + $0x60] sm:$0xff]  }
  0x3f   : > { %v1996_v44 = vsel %vm624_vm3, %v667_v29, %v671_v38  ;;  %v1588_v47 = vunpack.c.l.bf16 %v1596_v37  ;;  %v1589_v48 = vunpack.c.h.bf16 %v1596_v37  ;;  %v2000_v50 = vpack.c.bf16 %v524_v39, %v586_v40 }
  0x40   : > { %798 = vrot.lane.b32.xlu0 %v648_v33, %s1737_s13  ;;  %v525_v51 = vsel %vm458_vm7, %v428_v31, %v495_v41  ;;  %vm459_vm9 = vcmp.gt.f32.partialorder %v429_v42, 0.0  ;;  %v496_v53 = vmul.f32 %v1851_v23, %v429_v42  ;;  %vm460_vm10 = vcmp.gt.f32.partialorder %v430_v43, 0.0 }
  0x41   : > { %v588_v54 = vsel %vm550_vm1, %v525_v51, 0.0  ;;  %v497_v55 = vmul.f32 %v1851_v23, %v430_v43  ;;  %v431_v56 = vadd.f32 %v1841_v13, %v394_v45  ;;  %v395_v59 = vmul.f32 %v1588_v47, %v1827_v2 }
  0x42   : > { %894 = vrot.lane.b32.xlu1 %v1996_v44, %s1739_s15  ;;  %v526_v58 = vsel %vm459_vm9, %v429_v42, %v496_v53  ;;  %v396_v60 = vmul.f32 %v1589_v48, %v1827_v2  ;;  %v360_v61 = vunpack.c.l.bf16 %v330_v52  ;;  %v747_v62 = vrot.slane %v1892_v57, 1 }
  0x43   : > { %v748_v63 = vrot.slane %v1974_v21, 1  ;;  %v676_v0 = vshll.u32 %v2000_v50, 16  ;;  %v2018_v3 = vpack.c.bf16 %v588_v54, %v588_v54  ;;  %v432_v4 = vadd.f32 %v1841_v13, %v395_v59  ;;  %v336_v59 = vld [vmem:[%s1822_s11 + $0x68] sm:$0x1] }
  0x44   : > { %844 = vrot.lane.b32.xlu0 %v648_v33, %s1738_s14  ;;  %v527_v5 = vsel %vm460_vm10, %v430_v43, %v497_v55  ;;  %v589_v7 = vsel %vm545_vm0, %v526_v58, 0.0  ;;  %v498_v8 = vmul.f32 %v1851_v23, %v431_v56  ;;  %v433_v9 = vadd.f32 %v1841_v13, %v396_v60 }
  0x45   : > { %vm461_vm11 = vcmp.gt.f32.partialorder %v431_v56, 0.0  ;;  %vm462_vm12 = vcmp.gt.f32.partialorder %v432_v4, 0.0  ;;  %v499_v10 = vmul.f32 %v1851_v23, %v432_v4  ;;  %v397_v12 = vmul.f32 %v1827_v2, %v360_v61 }
  0x46   : > { %800 = vrot.lane.b32.xlu1 %v1972_v20, %s1737_s13  ;;  %v2031_v15 = vsel %vm737_vm8, %v747_v62, %v748_v63  ;;  %v674_v16 = vshrl.u32 %v2000_v50, 16  ;;  %v678_v17 = vrot.slane %v676_v0, 1  ;;  %v681_v18 = vshll.u32 %v2018_v3, 16 }
  0x47   : > { %v2037_v19 = vpack.c.bf16 %v527_v5, %v589_v7  ;;  %vm463_vm13 = vcmp.gt.f32.partialorder %v433_v9, 0.0  ;;  %v500_v21 = vmul.f32 %v1851_v23, %v433_v9  ;;  %v528_v24 = vsel %vm461_vm11, %v431_v56, %v498_v8 }
  0x48   : > { %892 = vrot.lane.b32.xlu0 %v1972_v20, %s1739_s15  ;;  %v529_v20 = vsel %vm462_vm12, %v432_v4, %v499_v10  ;;  %v434_v25 = vadd.f32 %v1841_v13, %v397_v12  ;;  %v361_v26 = vunpack.c.l.bf16 %v331_v14  ;;  %v591_v31 = vsel %vm550_vm1, %v528_v24, 0.0 }
  0x49   : > { %v530_v27 = vsel %vm463_vm13, %v433_v9, %v500_v21  ;;  %v592_v28 = vsel %vm545_vm0, %v529_v20, 0.0  ;;  %v362_v32 = vunpack.c.h.bf16 %v331_v14  ;;  %v679_v36 = vor.u32 %v678_v17, %v674_v16 }
  0x4a   : > { %802 = vrot.lane.b32.xlu1 %v1996_v44, %s1737_s13  ;;  %v2045_v29 = vpack.c.bf16 %v530_v27, %v592_v28  ;;  %vm464_vm14 = vcmp.gt.f32.partialorder %v434_v25, 0.0  ;;  %v501_v30 = vmul.f32 %v1851_v23, %v434_v25  ;;  %v398_v33 = vmul.f32 %v1827_v2, %v361_v26  ;;  %v337_v26 = vld [vmem:[%s1822_s11 + $0x6c] sm:$0xff]  }
  0x4b   : > { %v683_v37 = vrot.slane %v681_v18, 1  ;;  %v688_v38 = vshll.u32 %v2037_v19, 16  ;;  %v750_v40 = vrot.slane %v2000_v50, 1  ;;  %v399_v42 = vmul.f32 %v1827_v2, %v362_v32 }
  0x4c   : > { %910 = vrot.lane.b32.xlu0 %v2031_v15, %s1736_s12  ;;  %v531_v39 = vsel %vm464_vm14, %v434_v25, %v501_v30  ;;  %v435_v43 = vadd.f32 %v1841_v13, %v398_v33  ;;  %v751_v45 = vrot.slane %v2018_v3, 1  ;;  %v2066_v47 = vpack.c.bf16 %v591_v31, %v591_v31 }
  0x4d   : > { %v2059_v41 = vsel %vm550_vm1, %v531_v39, 0.0  ;;  %v363_v48 = vunpack.c.l.bf16 %v333_v34  ;;  %v1592_v51 = vunpack.c.l.bf16 %v1597_v35  ;;  %v436_v52 = vadd.f32 %v1841_v13, %v399_v42 }
  0x4e   : > { %818 = vrot.lane.b32.xlu1 %v2031_v15, %s1735_s30  ;;  %vm465_vm15 = vcmp.gt.f32.partialorder %v435_v43, 0.0  ;;  %v502_v53 = vmul.f32 %v1851_v23, %v435_v43  ;;  %v1593_v54 = vunpack.c.h.bf16 %v1597_v35  ;;  %v2073_v55 = vsel %vm624_vm3, %v679_v36, %v683_v37 }
  0x4f   : > { %v690_v56 = vrot.slane %v688_v38, 1  ;;  %v400_v58 = vmul.f32 %v1827_v2, %v363_v48  ;;  %vm466_vm2 = vcmp.gt.f32.partialorder %v436_v52, 0.0  ;;  %v503_v60 = vmul.f32 %v1851_v23, %v436_v52 }
  0x50   : > { %816 = vrot.lane.b32.xlu0 %v1960_v11, %s1735_s30  ;;  %v686_v11 = vshrl.u32 %v2037_v19, 16  ;;  %v532_v61 = vsel %vm465_vm15, %v435_v43, %v502_v53  ;;  %v401_v62 = vmul.f32 %v1592_v51, %v1827_v2  ;;  %v2083_v63 = vsel %vm737_vm8, %v750_v40, %v751_v45 }
  0x51   : > { %v693_v0 = vshll.u32 %v2066_v47, 16  ;;  %v595_v3 = vsel %vm545_vm0, %v532_v61, 0.0  ;;  %v437_v4 = vadd.f32 %v1841_v13, %v400_v58  ;;  %v533_v5 = vsel %vm466_vm2, %v436_v52, %v503_v60  ;;  %v339_v58 = vld [vmem:[%s1822_s11 + $0x74] sm:$0x1] }
  0x52   : > { %834 = vrot.lane.b32.xlu1 %v2000_v50, %s1732_s19  ;;  %v402_v7 = vmul.f32 %v1593_v54, %v1827_v2  ;;  %v438_v8 = vadd.f32 %v1841_v13, %v401_v62  ;;  %v366_v9 = vunpack.c.l.bf16 %v336_v59  ;;  %v691_v10 = vor.u32 %v690_v56, %v686_v11 }
  0x53   : > { %v2093_v12 = vpack.c.bf16 %v533_v5, %v595_v3  ;;  %vm467_vm4 = vcmp.gt.f32.partialorder %v437_v4, 0.0  ;;  %v504_v14 = vmul.f32 %v1851_v23, %v437_v4  ;;  %v695_v21 = vrot.slane %v693_v0, 1 }
  0x54   : > { %832 = vrot.lane.b32.xlu0 %v1892_v57, %s1732_s19  ;;  %v439_v16 = vadd.f32 %v1841_v13, %v402_v7  ;;  %vm468_vm5 = vcmp.gt.f32.partialorder %v438_v8, 0.0  ;;  %v505_v17 = vmul.f32 %v1851_v23, %v438_v8  ;;  %v403_v18 = vmul.f32 %v1827_v2, %v366_v9 }
  0x55   : > { %v534_v24 = vsel %vm467_vm4, %v437_v4, %v504_v14  ;;  %v710_v20 = vshrl.u32 %v2093_v12, 16  ;;  %v712_v25 = vshll.u32 %v2093_v12, 16  ;;  %v367_v35 = vunpack.c.l.bf16 %v337_v26 }
  0x56   : > { %850 = vrot.lane.b32.xlu1 %v2073_v55, %s1738_s14  ;;  %v597_v27 = vsel %vm550_vm1, %v534_v24, 0.0  ;;  %vm469_vm6 = vcmp.gt.f32.partialorder %v439_v16, 0.0  ;;  %v535_v28 = vsel %vm468_vm5, %v438_v8, %v505_v17  ;;  %v440_v33 = vadd.f32 %v1841_v13, %v403_v18 }
  0x57   : > { %v2113_v30 = vpack.c.bf16 %v597_v27, %v597_v27  ;;  %v714_v31 = vrot.slane %v712_v25, 1  ;;  %v598_v32 = vsel %vm545_vm0, %v535_v28, 0.0  ;;  %v368_v36 = vunpack.c.h.bf16 %v337_v26 }
  0x58   : > { %848 = vrot.lane.b32.xlu0 %v1996_v44, %s1738_s14  ;;  %v506_v44 = vmul.f32 %v1851_v23, %v439_v16  ;;  %v566_v40 = vstv %s2106_s16  ;;  %vm470_vm7 = vcmp.gt.f32.partialorder %v440_v33, 0.0  ;;  %v507_v42 = vmul.f32 %v1851_v23, %v440_v33 }
  0x59   : > { %v715_v37 = vor.u32 %v714_v31, %v710_v20  ;;  %v717_v38 = vshll.u32 %v2113_v30, 16  ;;  %v404_v43 = vmul.f32 %v1827_v2, %v367_v35  ;;  %v405_v45 = vmul.f32 %v1827_v2, %v368_v36 }
  0x5a   : > { %866 = vrot.lane.b32.xlu1 %v2083_v63, %s1734_s29  ;;  %v536_v34 = vsel %vm469_vm6, %v439_v16, %v506_v44  ;;  %v2130_v48 = vsel %vm624_vm3, %v691_v10, %v695_v21  ;;  %v537_v53 = vsel %vm470_vm7, %v440_v33, %v507_v42  ;;  %vm2145_vm9 = vcmp.eq.s32.totalorder %v566_v40, 1 }
  0x5b   : > { %v2121_v39 = vpack.c.bf16 %v536_v34, %v598_v32  ;;  %v441_v11 = vadd.f32 %v1841_v13, %v404_v43  ;;  %v442_v56 = vadd.f32 %v1841_v13, %v405_v45  ;;  %v600_v60 = vsel %vm550_vm1, %v537_v53, 0.0  ;;  %vm2156_vm12 = vmand %vm545_vm0, %vm2145_vm9 }
  0x5c   : > { %864 = vrot.lane.b32.xlu0 %v2031_v15, %s1734_s29  ;;  %v719_v15 = vrot.slane %v717_v38, 1  ;;  %v621_v0 = vpack.c.bf16 %v600_v60, %v600_v60  ;;  %v753_v5 = vrot.slane %v2037_v19, 1  ;;  %v369_v8 = vunpack.c.l.bf16 %v339_v58  ;;  %vm2166_vm13 = vmand %vm550_vm1, %vm2145_vm9 }
  0x5d   : > { %v763_v51 = vshrl.u32 %v2121_v39, 16  ;;  %v765_v52 = vshll.u32 %v2121_v39, 16  ;;  %v776_v54 = vrot.slane %v2121_v39, 1  ;;  %vm471_vm10 = vcmp.gt.f32.partialorder %v441_v11, 0.0 }
  0x5e   : > { %882 = vrot.lane.b32.xlu1 %v2037_v19, %s1733_s20  ;;  %v2141_v59 = vsel %vm624_vm3, %v715_v37, %v719_v15  ;;  %vm472_vm11 = vcmp.gt.f32.partialorder %v442_v56, 0.0  ;;  %v508_v3 = vmul.f32 %v1851_v23, %v441_v11  ;;  %v509_v7 = vmul.f32 %v1851_v23, %v442_v56 }
  0x5f   : > { %v767_v61 = vrot.slane %v765_v52, 1  ;;  %v770_v14 = vshll.u32 %v621_v0, 16  ;;  %v777_v1 = vrot.slane %v621_v0, 1  ;;  %v754_v17 = vrot.slane %v2066_v47, 1 }
  0x60   : > { %880 = vrot.lane.b32.xlu0 %v2000_v50, %s1733_s20  ;;  %v538_v16 = vsel %vm471_vm10, %v441_v11, %v508_v3  ;;  %v539_v18 = vsel %vm472_vm11, %v442_v56, %v509_v7  ;;  %v406_v24 = vmul.f32 %v1827_v2, %v369_v8  ;;  %v700_v20 = vshll.u32 %v2045_v29, 16 }
  0x61   : > { %v768_v10 = vor.u32 %v767_v61, %v763_v51  ;;  %v601_v21 = vsel %vm2156_vm12, %v538_v16, 0.0  ;;  %v772_v25 = vrot.slane %v770_v14, 1  ;;  %v2183_v26 = vsel %vm737_vm8, %v776_v54, %v777_v1 }
  0x62   : > { %898 = vrot.lane.b32.xlu1 %v2130_v48, %s1739_s15  ;;  %v602_v47 = vsel %vm2145_vm9, %v539_v18, 0.0  ;;  %v617_v27 = vpack.c.bf16 %v2059_v41, %v2059_v41  ;;  %v443_v44 = vadd.f32 %v1841_v13, %v406_v24  ;;  %vm1097_vm0 = vcmask 1041408  }
  0x63   : > { %v2189_v2 = vpack.c.bf16 %v602_v47, %v601_v21  ;;  %v2193_v28 = vsel %vm624_vm3, %v768_v10, %v772_v25  ;;  %1637 = vmatprep.subr.msk.bf16.mxu0 %vm1097_vm0, %v1691_v6  ;;  %v755_v41 = vsel %vm737_vm8, %v753_v5, %v754_v17  ;;  %v698_v13 = vshrl.u32 %v2045_v29, 16  ;;  %1638 = vmatprep.subr.msk.bf16.mxu1 %vm1097_vm0, %v1691_v6 }
  0x64   : > { %896 = vrot.lane.b32.xlu0 %v2073_v55, %s1739_s15  ;;  %vm473_vm1 = vcmp.gt.f32.partialorder %v443_v44, 0.0  ;;  %v702_v32 = vrot.slane %v700_v20, 1  ;;  %v1099_v33 = vsel %vm1097_vm0, %v1691_v6, 0  ;;  %v705_v34 = vshll.u32 %v617_v27, 16 }
  0x65   : > { %v782_v31 = vshll.u32 %v2189_v2, 16  ;;  %v780_v36 = vshrl.u32 %v2189_v2, 16  ;;  %1614 = vmatpush3.bf16.msra.mxu0 %v1099_v33  ;;  %1636 = vmatpush3.bf16.msra.mxu1 %v1099_v33  ;;  %v793_v40 = vrot.slane %v2189_v2, 1  ;;  %v756_v11 = vrot.slane %v2045_v29, 1 }
  0x66   : > { %804 = vrot.lane.b32.xlu1 %v2073_v55, %s1737_s13  ;;  %v510_v55 = vmul.f32 %v1851_v23, %v443_v44  ;;  %v703_v42 = vor.u32 %v702_v32, %v698_v13  ;;  %v707_v43 = vrot.slane %v705_v34, 1  ;;  %v757_v56 = vrot.slane %v617_v27, 1 }
  0x67   : > { %v784_v37 = vrot.slane %v782_v31, 1  ;;  %v759_v60 = vrot.slane %v2093_v12, 1  ;;  %vm958_vm14 = vcmask 97280   ;;  %vm975_vm15 = vcmask 130048  }
  0x68   : > { %912 = vrot.lane.b32.xlu0 %v2083_v63, %s1736_s12  ;;  %v540_v35 = vsel %vm473_vm1, %v443_v44, %v510_v55  ;;  %v708_v54 = vsel %vm624_vm3, %v703_v42, %v707_v43  ;;  %vm992_vm2 = vcmask 162816   ;;  %vm1009_vm4 = vcmask 195584  }
  0x69   : > { %v603_v23 = vsel %vm2166_vm13, %v540_v35, 0.0  ;;  %v785_v45 = vor.u32 %v784_v37, %v780_v36  ;;  %vm1043_vm5 = vcmask 261120   ;;  %vm1026_vm6 = vcmask 228352  }
  0x6a   : > { %806 = vrot.lane.b32.xlu1 %v2130_v48, %s1737_s13  ;;  %v623_v38 = vpack.c.bf16 %v603_v23, %v603_v23  ;;  %vm1080_vm7 = vcmask 293888   ;;  %vm1262_vm9 = vcmask 27648   ;;  %vm1369_vm10 = vcmask 1040384  }
  0x6b   : > { %vm1371_vm11 = vcmask 25600  }
  0x6c   : > { %914 = vrot.lane.b32.xlu0 %v755_v41, %s1736_s12  ;;  %v787_v15 = vshll.u32 %v623_v38, 16  ;;  %v794_v51 = vrot.slane %v623_v38, 1 }
  0x6e   : > { %822 = vrot.lane.b32.xlu1 %v755_v41, %s1735_s30  ;;  %v789_v52 = vrot.slane %v787_v15, 1  ;;  %v795_v53 = vsel %vm737_vm8, %v793_v40, %v794_v51 }
  0x70   : > { %820 = vrot.lane.b32.xlu0 %v2083_v63, %s1735_s30  ;;  %v790_v58 = vsel %vm624_vm3, %v785_v45, %v789_v52  ;;  %v758_v63 = vsel %vm737_vm8, %v756_v11, %v757_v56  ;;  %vm941_vm3 = vcmask 64512  }
  0x72   : > { %838 = vrot.lane.b32.xlu1 %v2045_v29, %s1732_s19 }
  0x74   : > { %836 = vrot.lane.b32.xlu0 %v2037_v19, %s1732_s19 }
  0x76   : > { %854 = vrot.lane.b32.xlu1 %v708_v54, %s1738_s14 }
  0x78   : > { %852 = vrot.lane.b32.xlu0 %v2130_v48, %s1738_s14  ;;  %v760_v48 = vrot.slane %v2113_v30, 1 }
  0x7a   : > { %870 = vrot.lane.b32.xlu1 %v758_v63, %s1734_s29  ;;  %v761_v61 = vsel %vm737_vm8, %v759_v60, %v760_v48  ;;  %vm924_vm8 = vcmask 31744  }
  0x7c   : > { %868 = vrot.lane.b32.xlu0 %v755_v41, %s1734_s29 }
  0x7e   : > { %886 = vrot.lane.b32.xlu1 %v2093_v12, %s1733_s20 }
  0x80   : > { %884 = vrot.lane.b32.xlu0 %v2045_v29, %s1733_s20 }
  0x82   : > { %902 = vrot.lane.b32.xlu1 %v2141_v59, %s1739_s15 }
  0x84   : > { %900 = vrot.lane.b32.xlu0 %v708_v54, %s1739_s15 }
  0x86   : > { %808 = vrot.lane.b32.xlu1 %v708_v54, %s1737_s13 }
  0x88   : > { %916 = vrot.lane.b32.xlu0 %v758_v63, %s1736_s12 }
  0x8a   : > { %810 = vrot.lane.b32.xlu1 %v2141_v59, %s1737_s13 }
  0x8c   : > { %918 = vrot.lane.b32.xlu0 %v761_v61, %s1736_s12 }
  0x8e   : > { %826 = vrot.lane.b32.xlu1 %v761_v61, %s1735_s30 }
  0x90   : > { %824 = vrot.lane.b32.xlu0 %v758_v63, %s1735_s30 }
  0x92   : > { %842 = vrot.lane.b32.xlu1 %v2121_v39, %s1732_s19 }
  0x94   : > { %840 = vrot.lane.b32.xlu0 %v2093_v12, %s1732_s19  ;;  %s298_s19 = sadd.s32 %s1522_s18, %s1521_s17 }
  0x96   : > { %858 = vrot.lane.b32.xlu1 %v2193_v28, %s1738_s14 }
  0x97   : > { %v831_v30 = vpop.permute.xlu1 %830 }
  0x98   : > { %856 = vrot.lane.b32.xlu0 %v2141_v59, %s1738_s14  ;;  %v829_v62 = vpop.permute.xlu0 %828  ;;  %s308_s14 = scalar_lea.vmem %s2440_s6, %s1525_s10 }
  0x9a   : > { %874 = vrot.lane.b32.xlu1 %v2183_v26, %s1734_s29 }
  0x9b   : > { %v879_v0 = vpop.permute.xlu1 %878 }
  0x9c   : > { %872 = vrot.lane.b32.xlu0 %v761_v61, %s1734_s29  ;;  %v877_v3 = vpop.permute.xlu0 %876 }
  0x9e   : > { %890 = vrot.lane.b32.xlu1 %v2189_v2, %s1733_s20 }
  0xa0   : > { %888 = vrot.lane.b32.xlu0 %v2121_v39, %s1733_s20  ;;  %v861_v59 = vpop.permute.xlu0 %860  ;;  %s1523_s20 = sshll.u32 %s298_s19, 2 }
  0xa1   : > { %s2348_s7 = scalar_lea.vmem %s2439_s5, %s1523_s20 }
  0xa2   : > { %906 = vrot.lane.b32.xlu1 %v790_v58, %s1739_s15 }
  0xa4   : > { %v813_v4 = vpop.permute.xlu1 %812  ;;  %904 = vrot.lane.b32.xlu0 %v2193_v28, %s1739_s15 }
  0xa6   : > { %922 = vrot.lane.b32.xlu1 %v795_v53, %s1736_s12 }
  0xa8   : > { %v815_v5 = vpop.permute.xlu1 %814  ;;  %920 = vrot.lane.b32.xlu0 %v2183_v26, %s1736_s12 }
  0xaa   : > { %v909_v7 = vpop.permute.xlu0 %908 }
  0xac   : > { %v863_v8 = vpop.permute.xlu1 %862 }
  0xae   : > { %v797_v9 = vpop.permute.xlu0 %796 }
  0xaf   : > { %v926_v39 = vsel %vm924_vm8, %v1925_v22, %v797_v9 }
  0xb0   : > { %v847_v10 = vpop.permute.xlu1 %846  ;;  %v943_v1 = vsel %vm941_vm3, %v926_v39, %v813_v4 }
  0xb1   : > { %v960_v6 = vsel %vm958_vm14, %v943_v1, %v829_v62 }
  0xb2   : > { %v799_v14 = vpop.permute.xlu0 %798 }
  0xb3   : > { %v928_v16 = vsel %vm924_vm8, %v1879_v49, %v799_v14 }
  0xb4   : > { %v895_v17 = vpop.permute.xlu1 %894  ;;  %v945_v18 = vsel %vm941_vm3, %v928_v16, %v815_v5 }
  0xb5   : > { %v962_v21 = vsel %vm958_vm14, %v945_v18, %v831_v30 }
  0xb6   : > { %v979_v24 = vsel %vm975_vm15, %v962_v21, %v847_v10  ;;  %v845_v22 = vpop.permute.xlu0 %844 }
  0xb7   : > { %v977_v20 = vsel %vm975_vm15, %v960_v6, %v845_v22  ;;  %v996_v26 = vsel %vm992_vm2, %v979_v24, %v863_v8 }
  0xb8   : > { %v801_v25 = vpop.permute.xlu1 %800  ;;  %v994_v49 = vsel %vm992_vm2, %v977_v20, %v861_v59  ;;  %v1013_v2 = vsel %vm1009_vm4, %v996_v26, %v879_v0 }
  0xb9   : > { %v1011_v47 = vsel %vm1009_vm4, %v994_v49, %v877_v3  ;;  %v1030_v31 = vsel %vm1026_vm6, %v1013_v2, %v895_v17  ;;  %v930_v45 = vsel %vm924_vm8, %v1872_v46, %v801_v25 }
  0xba   : > { %v893_v27 = vpop.permute.xlu0 %892 }
  0xbb   : > { %v1028_v44 = vsel %vm1026_vm6, %v1011_v47, %v893_v27 }
  0xbc   : > { %v803_v28 = vpop.permute.xlu1 %802  ;;  %v1045_v55 = vsel %vm1043_vm5, %v1028_v44, %v909_v7 }
  0xbd   : > { %1615 = vmatprep.mubr.msk.bf16.mxu0 %vm1080_vm7, %v1045_v55  ;;  %v932_v11 = vsel %vm924_vm8, %v1892_v57, %v803_v28 }
  0xbe   : > { %v911_v41 = vpop.permute.xlu0 %910 }
  0xbf   : > { %v1047_v13 = vsel %vm1043_vm5, %v1030_v31, %v911_v41 }
  0xc0   : > { %v819_v32 = vpop.permute.xlu1 %818  ;;  %1616 = vmatmul.mubr.msk.bf16.vlgmr.msra.gmra.mrb[0].mxu0 %vm1080_vm7, %v1047_v13 }
  0xc1   : > { %v949_v58 = vsel %vm941_vm3, %v932_v11, %v819_v32 }
  0xc2   : > { %v817_v33 = vpop.permute.xlu0 %816 }
  0xc3   : > { %v947_v15 = vsel %vm941_vm3, %v930_v45, %v817_v33 }
  0xc4   : > { %v835_v34 = vpop.permute.xlu1 %834 }
  0xc5   : > { %v966_v60 = vsel %vm958_vm14, %v949_v58, %v835_v34 }
  0xc6   : > { %v833_v35 = vpop.permute.xlu0 %832 }
  0xc7   : > { %v964_v51 = vsel %vm958_vm14, %v947_v15, %v833_v35 }
  0xc8   : > { %v851_v36 = vpop.permute.xlu1 %850 }
  0xc9   : > { %v983_v61 = vsel %vm975_vm15, %v966_v60, %v851_v36 }
  0xca   : > { %v849_v37 = vpop.permute.xlu0 %848 }
  0xcb   : > { %v981_v53 = vsel %vm975_vm15, %v964_v51, %v849_v37 }
  0xcc   : > { %v867_v23 = vpop.permute.xlu1 %866 }
  0xcd   : > { %v1000_v0 = vsel %vm992_vm2, %v983_v61, %v867_v23 }
  0xce   : > { %v865_v38 = vpop.permute.xlu0 %864 }
  0xcf   : > { %v998_v56 = vsel %vm992_vm2, %v981_v53, %v865_v38 }
  0xd0   : > { %v883_v40 = vpop.permute.xlu1 %882 }
  0xd1   : > { %v1017_v57 = vsel %vm1009_vm4, %v1000_v0, %v883_v40 }
  0xd2   : > { %v881_v42 = vpop.permute.xlu0 %880 }
  0xd3   : > { %v1015_v63 = vsel %vm1009_vm4, %v998_v56, %v881_v42 }
  0xd4   : > { %v899_v43 = vpop.permute.xlu1 %898 }
  0xd5   : > { %v1034_v3 = vsel %vm1026_vm6, %v1017_v57, %v899_v43 }
  0xd6   : > { %v897_v52 = vpop.permute.xlu0 %896 }
  0xd7   : > { %v1032_v46 = vsel %vm1026_vm6, %v1015_v63, %v897_v52 }
  0xd8   : > { %v805_v54 = vpop.permute.xlu1 %804 }
  0xd9   : > { %v934_v21 = vsel %vm924_vm8, %v2000_v50, %v805_v54 }
  0xda   : > { %v913_v48 = vpop.permute.xlu0 %912 }
  0xdb   : > { %v1049_v30 = vsel %vm1043_vm5, %v1032_v46, %v913_v48 }
  0xdc   : > { %v807_v62 = vpop.permute.xlu1 %806  ;;  %1619 = vmatprep.mubr.msk.bf16.mxu0 %vm1080_vm7, %v1049_v30 }
  0xdd   : > { %v936_v26 = vsel %vm924_vm8, %v2037_v19, %v807_v62 }
  0xde   : > { %v915_v4 = vpop.permute.xlu0 %914 }
  0xdf   : > { %v1051_v59 = vsel %vm1043_vm5, %v1034_v3, %v915_v4 }
  0xe0   : > { %v823_v5 = vpop.permute.xlu1 %822  ;;  %1620 = vmatmul.mubr.msk.bf16.gmra.mrb[4].mxu0 %vm1080_vm7, %v1051_v59 }
  0xe1   : > { %v953_v47 = vsel %vm941_vm3, %v936_v26, %v823_v5 }
  0xe2   : > { %v821_v7 = vpop.permute.xlu0 %820 }
  0xe3   : > { %v951_v24 = vsel %vm941_vm3, %v934_v21, %v821_v7 }
  0xe4   : > { %v839_v8 = vpop.permute.xlu1 %838 }
  0xe5   : > { %v970_v2 = vsel %vm958_vm14, %v953_v47, %v839_v8 }
  0xe6   : > { %v837_v9 = vpop.permute.xlu0 %836 }
  0xe7   : > { %v968_v6 = vsel %vm958_vm14, %v951_v24, %v837_v9 }
  0xe8   : > { %v855_v10 = vpop.permute.xlu1 %854 }
  0xe9   : > { %v987_v28 = vsel %vm975_vm15, %v970_v2, %v855_v10 }
  0xea   : > { %v853_v39 = vpop.permute.xlu0 %852 }
  0xeb   : > { %v985_v20 = vsel %vm975_vm15, %v968_v6, %v853_v39 }
  0xec   : > { %v871_v14 = vpop.permute.xlu1 %870 }
  0xed   : > { %v1004_v41 = vsel %vm992_vm2, %v987_v28, %v871_v14 }
  0xee   : > { %v869_v1 = vpop.permute.xlu0 %868 }
  0xef   : > { %v1002_v49 = vsel %vm992_vm2, %v985_v20, %v869_v1 }
  0xf0   : > { %v887_v16 = vpop.permute.xlu1 %886 }
  0xf1   : > { %v1021_v19 = vsel %vm1009_vm4, %v1004_v41, %v887_v16 }
  0xf2   : > { %v885_v17 = vpop.permute.xlu0 %884 }
  0xf3   : > { %v1019_v27 = vsel %vm1009_vm4, %v1002_v49, %v885_v17 }
  0xf4   : > { %v903_v18 = vpop.permute.xlu1 %902 }
  0xf5   : > { %v1038_v13 = vsel %vm1026_vm6, %v1021_v19, %v903_v18 }
  0xf6   : > { %v901_v22 = vpop.permute.xlu0 %900 }
  0xf7   : > { %v1036_v50 = vsel %vm1026_vm6, %v1019_v27, %v901_v22 }
  0xf8   : > { %v809_v25 = vpop.permute.xlu1 %808 }
  0xf9   : > { %v938_v52 = vsel %vm924_vm8, %v2045_v29, %v809_v25 }
  0xfa   : > { %v917_v44 = vpop.permute.xlu0 %916 }
  0xfb   : > { %v1053_v55 = vsel %vm1043_vm5, %v1036_v50, %v917_v44 }
  0xfc   : > { %v811_v31 = vpop.permute.xlu1 %810  ;;  %1623 = vmatprep.mubr.msk.bf16.mxu1 %vm1080_vm7, %v1053_v55 }
  0xfd   : > { %v940_v15 = vsel %vm924_vm8, %v2093_v12, %v811_v31 }
  0xfe   : > { %v919_v32 = vpop.permute.xlu0 %918 }
  0xff   : > { %v1055_v33 = vsel %vm1043_vm5, %v1038_v13, %v919_v32 }
 0x100   : > { %v827_v34 = vpop.permute.xlu1 %826  ;;  %1624 = vmatmul.mubr.msk.bf16.vlgmr.msra.gmra.mrb[0].mxu1 %vm1080_vm7, %v1055_v33 }
 0x101   : > { %v957_v53 = vsel %vm941_vm3, %v940_v15, %v827_v34 }
 0x102   : > { %v825_v35 = vpop.permute.xlu0 %824 }
 0x103   : > { %v955_v54 = vsel %vm941_vm3, %v938_v52, %v825_v35 }
 0x104   : > { %v843_v36 = vpop.permute.xlu1 %842 }
 0x105   : > { %v974_v11 = vsel %vm958_vm14, %v957_v53, %v843_v36 }
 0x106   : > { %v841_v37 = vpop.permute.xlu0 %840 }
 0x107   : > { %v972_v56 = vsel %vm958_vm14, %v955_v54, %v841_v37 }
 0x108   : > { %v859_v23 = vpop.permute.xlu1 %858 }
 0x109   : > { %v991_v58 = vsel %vm975_vm15, %v974_v11, %v859_v23 }
 0x10a   : > { %v857_v38 = vpop.permute.xlu0 %856 }
 0x10b   : > { %v989_v60 = vsel %vm975_vm15, %v972_v56, %v857_v38 }
 0x10c   : > { %v875_v40 = vpop.permute.xlu1 %874 }
 0x10d   : > { %v1008_v12 = vsel %vm992_vm2, %v991_v58, %v875_v40 }
 0x10e   : > { %v873_v42 = vpop.permute.xlu0 %872 }
 0x10f   : > { %v1006_v29 = vsel %vm992_vm2, %v989_v60, %v873_v42 }
 0x110   : > { %v891_v43 = vpop.permute.xlu1 %890 }
 0x111   : > { %v1025_v48 = vsel %vm1009_vm4, %v1008_v12, %v891_v43 }
 0x112   : > { %v889_v45 = vpop.permute.xlu0 %888 }
 0x113   : > { %v1023_v61 = vsel %vm1009_vm4, %v1006_v29, %v889_v45 }
 0x114   : > { %v907_v51 = vpop.permute.xlu1 %906 }
 0x115   : > { %v1042_v30 = vsel %vm1026_vm6, %v1025_v48, %v907_v51 }
 0x116   : > { %v905_v63 = vpop.permute.xlu0 %904 }
 0x117   : > { %v1040_v62 = vsel %vm1026_vm6, %v1023_v61, %v905_v63 }
 0x118   : > { %v923_v46 = vpop.permute.xlu1 %922 }
 0x119   : > { %v1059_v0 = vsel %vm1043_vm5, %v1042_v30, %v923_v46 }
 0x11a   : > { %v921_v57 = vpop.permute.xlu0 %920 }
 0x11b   : > { %v1057_v3 = vsel %vm1043_vm5, %v1040_v62, %v921_v57 }
 0x11c   : > { %1627 = vmatprep.mubr.msk.bf16.mxu1 %vm1080_vm7, %v1057_v3 }
 0x11d   : > { %1628 = vmatmul.mubr.msk.bf16.gmra.mrb[4].mxu1 %vm1080_vm7, %v1059_v0 }
 0x193   : > { %v1617_v4 = vpop.f32.mrb[0].mxu0 }
 0x194   : > { %v1560_v59 = vpack.c.bf16 %v1617_v4, %v1617_v4  ;;  %v1135_v5 = vpop.f32.mrb[1].mxu0  ;;  %v1318_v10 = vmul.f32 %v1617_v4, %v1617_v4  ;;  %v1282_v24 = vsel %vm924_vm8, %v1617_v4, 0.0 }
 0x195   : > { %v1558_v7 = vpack.c.bf16 %v1135_v5, %v1135_v5  ;;  %v1316_v8 = vmul.f32 %v1135_v5, %v1135_v5  ;;  %v1618_v9 = vpop.f32.mrb[2].mxu0  ;;  %v1279_v1 = vsel %vm924_vm8, %v1135_v5, 0.0 }
 0x196   : > { %1265 = vst.msk [vmem:[%s2348_s7 + $0x8] sm:$0xf] %vm1262_vm9, %v1560_v59  ;;  %v1561_v39 = vpack.c.bf16 %v1618_v9, %v1618_v9  ;;  %v1138_v14 = vpop.f32.mrb[3].mxu0  ;;  %v1319_v22 = vmul.f32 %v1618_v9, %v1618_v9  ;;  %v1335_v49 = vsel %vm924_vm8, %v1318_v10, 0.0  ;;  %v1284_v47 = vsel %vm924_vm8, %v1618_v9, 0.0 }
 0x197   : > { %1263 = vst.msk [vmem:[%s2348_s7] sm:$0xf] %vm1262_vm9, %v1558_v7  ;;  %v1559_v16 = vpack.c.bf16 %v1138_v14, %v1138_v14  ;;  %v1280_v17 = vsel %vm924_vm8, %v1138_v14, 0.0  ;;  %v1317_v18 = vmul.f32 %v1138_v14, %v1138_v14  ;;  %v1332_v6 = vsel %vm924_vm8, %v1316_v8, 0.0 }
 0x198   : > { %1266 = vst.msk [vmem:[%s2348_s7 + $0xc] sm:$0xf] %vm1262_vm9, %v1561_v39  ;;  %v1281_v21 = vadd.f32 %v1280_v17, %v1279_v1  ;;  %v1337_v50 = vsel %vm924_vm8, %v1319_v22, 0.0 }
 0x199   : > { %1264 = vst.msk [vmem:[%s2348_s7 + $0x4] sm:$0xf] %vm1262_vm9, %v1559_v16  ;;  %v1333_v20 = vsel %vm924_vm8, %v1317_v18, 0.0 }
 0x19a   : > { %v1283_v25 = vadd.f32 %v1282_v24, %v1281_v21  ;;  %v1334_v26 = vadd.f32 %v1333_v20, %v1332_v6 }
 0x19c   : > { %v1336_v27 = vadd.f32 %v1335_v49, %v1334_v26  ;;  %v1285_v2 = vadd.f32 %v1284_v47, %v1283_v25 }
 0x19e   : > { %v1338_v44 = vadd.f32 %v1337_v50, %v1336_v27 }
 0x1b3   : > { %v1621_v28 = vpop.f32.mrb[4].mxu0 }
 0x1b4   : > { %v1564_v55 = vpack.c.bf16 %v1621_v28, %v1621_v28  ;;  %v1151_v31 = vpop.f32.mrb[5].mxu0  ;;  %v1322_v38 = vmul.f32 %v1621_v28, %v1621_v28  ;;  %v1290_v45 = vsel %vm924_vm8, %v1621_v28, 0.0 }
 0x1b5   : > { %v1562_v41 = vpack.c.bf16 %v1151_v31, %v1151_v31  ;;  %v1286_v19 = vsel %vm924_vm8, %v1151_v31, 0.0  ;;  %v1320_v13 = vmul.f32 %v1151_v31, %v1151_v31  ;;  %v1622_v32 = vpop.f32.mrb[6].mxu0 }
 0x1b6   : > { %1269 = vst.msk [vmem:[%s2348_s7 + $0x18] sm:$0xf] %vm1262_vm9, %v1564_v55  ;;  %v1287_v33 = vadd.f32 %v1286_v19, %v1285_v2  ;;  %v1565_v34 = vpack.c.bf16 %v1622_v32, %v1622_v32  ;;  %v1154_v35 = vpop.f32.mrb[7].mxu0  ;;  %v1323_v15 = vmul.f32 %v1622_v32, %v1622_v32  ;;  %v1292_v53 = vsel %vm924_vm8, %v1622_v32, 0.0 }
 0x1b7   : > { %1267 = vst.msk [vmem:[%s2348_s7 + $0x10] sm:$0xf] %vm1262_vm9, %v1562_v41  ;;  %v1339_v36 = vsel %vm924_vm8, %v1320_v13, 0.0  ;;  %v1563_v37 = vpack.c.bf16 %v1154_v35, %v1154_v35  ;;  %v1288_v23 = vsel %vm924_vm8, %v1154_v35, 0.0  ;;  %v1321_v43 = vmul.f32 %v1154_v35, %v1154_v35 }
 0x1b8   : > { %v1340_v40 = vadd.f32 %v1339_v36, %v1338_v44  ;;  %1270 = vst.msk [vmem:[%s2348_s7 + $0x1c] sm:$0xf] %vm1262_vm9, %v1565_v34  ;;  %v1289_v42 = vadd.f32 %v1288_v23, %v1287_v33  ;;  %v1343_v11 = vsel %vm924_vm8, %v1322_v38, 0.0  ;;  %v1345_v63 = vsel %vm924_vm8, %v1323_v15, 0.0 }
 0x1b9   : > { %1268 = vst.msk [vmem:[%s2348_s7 + $0x14] sm:$0xf] %vm1262_vm9, %v1563_v37  ;;  %v1341_v52 = vsel %vm924_vm8, %v1321_v43, 0.0 }
 0x1ba   : > { %v1291_v51 = vadd.f32 %v1290_v45, %v1289_v42  ;;  %v1342_v54 = vadd.f32 %v1341_v52, %v1340_v40 }
 0x1bc   : > { %v1293_v56 = vadd.f32 %v1292_v53, %v1291_v51  ;;  %v1344_v58 = vadd.f32 %v1343_v11, %v1342_v54 }
 0x1be   : > { %v1346_v60 = vadd.f32 %v1345_v63, %v1344_v58 }
 0x1d3   : > { %v1625_v12 = vpop.f32.mrb[0].mxu1 }
 0x1d4   : > { %v1568_v46 = vpack.c.bf16 %v1625_v12, %v1625_v12  ;;  %v1167_v29 = vpop.f32.mrb[1].mxu1  ;;  %v1326_v7 = vmul.f32 %v1625_v12, %v1625_v12  ;;  %v1298_v39 = vsel %vm924_vm8, %v1625_v12, 0.0 }
 0x1d5   : > { %v1566_v48 = vpack.c.bf16 %v1167_v29, %v1167_v29  ;;  %v1294_v61 = vsel %vm924_vm8, %v1167_v29, 0.0  ;;  %v1324_v30 = vmul.f32 %v1167_v29, %v1167_v29  ;;  %v1626_v62 = vpop.f32.mrb[2].mxu1 }
 0x1d6   : > { %1273 = vst.msk [vmem:[%s2348_s7 + $0x28] sm:$0xf] %vm1262_vm9, %v1568_v46  ;;  %v1295_v0 = vadd.f32 %v1294_v61, %v1293_v56  ;;  %v1569_v57 = vpack.c.bf16 %v1626_v62, %v1626_v62  ;;  %v1170_v3 = vpop.f32.mrb[3].mxu1  ;;  %v1327_v14 = vmul.f32 %v1626_v62, %v1626_v62  ;;  %v1300_v17 = vsel %vm924_vm8, %v1626_v62, 0.0 }
 0x1d7   : > { %1271 = vst.msk [vmem:[%s2348_s7 + $0x20] sm:$0xf] %vm1262_vm9, %v1566_v48  ;;  %v1347_v4 = vsel %vm924_vm8, %v1324_v30, 0.0  ;;  %v1567_v59 = vpack.c.bf16 %v1170_v3, %v1170_v3  ;;  %v1296_v5 = vsel %vm924_vm8, %v1170_v3, 0.0  ;;  %v1325_v10 = vmul.f32 %v1170_v3, %v1170_v3 }
 0x1d8   : > { %v1348_v8 = vadd.f32 %v1347_v4, %v1346_v60  ;;  %1274 = vst.msk [vmem:[%s2348_s7 + $0x2c] sm:$0xf] %vm1262_vm9, %v1569_v57  ;;  %v1297_v9 = vadd.f32 %v1296_v5, %v1295_v0  ;;  %v1351_v21 = vsel %vm924_vm8, %v1326_v7, 0.0  ;;  %v1353_v22 = vsel %vm924_vm8, %v1327_v14, 0.0 }
 0x1d9   : > { %1272 = vst.msk [vmem:[%s2348_s7 + $0x24] sm:$0xf] %vm1262_vm9, %v1567_v59  ;;  %v1349_v16 = vsel %vm924_vm8, %v1325_v10, 0.0 }
 0x1da   : > { %v1299_v1 = vadd.f32 %v1298_v39, %v1297_v9  ;;  %v1350_v18 = vadd.f32 %v1349_v16, %v1348_v8 }
 0x1dc   : > { %v1301_v24 = vadd.f32 %v1300_v17, %v1299_v1  ;;  %v1352_v6 = vadd.f32 %v1351_v21, %v1350_v18 }
 0x1de   : > { %v1354_v20 = vadd.f32 %v1353_v22, %v1352_v6 }
 0x1f0   : > { %v1629_v25 = vpop.f32.mrb[4].mxu1 }
 0x1f1   : > { %v1572_v26 = vpack.c.bf16 %v1629_v25, %v1629_v25  ;;  %v1183_v49 = vpop.f32.mrb[5].mxu1  ;;  %v1330_v13 = vmul.f32 %v1629_v25, %v1629_v25  ;;  %v1306_v35 = vsel %vm924_vm8, %v1629_v25, 0.0 }
 0x1f2   : > { %v1570_v47 = vpack.c.bf16 %v1183_v49, %v1183_v49  ;;  %v1302_v27 = vsel %vm924_vm8, %v1183_v49, 0.0  ;;  %v1328_v2 = vmul.f32 %v1183_v49, %v1183_v49  ;;  %v1630_v50 = vpop.f32.mrb[6].mxu1 }
 0x1f3   : > { %1277 = vst.msk [vmem:[%s2348_s7 + $0x38] sm:$0xf] %vm1262_vm9, %v1572_v26  ;;  %v1303_v44 = vadd.f32 %v1302_v27, %v1301_v24  ;;  %v1573_v28 = vpack.c.bf16 %v1630_v50, %v1630_v50  ;;  %v1186_v55 = vpop.f32.mrb[7].mxu1  ;;  %v1331_v36 = vmul.f32 %v1630_v50, %v1630_v50  ;;  %v1308_v38 = vsel %vm924_vm8, %v1630_v50, 0.0 }
 0x1f4   : > { %1275 = vst.msk [vmem:[%s2348_s7 + $0x30] sm:$0xf] %vm1262_vm9, %v1570_v47  ;;  %v1355_v31 = vsel %vm924_vm8, %v1328_v2, 0.0  ;;  %v1571_v41 = vpack.c.bf16 %v1186_v55, %v1186_v55  ;;  %v1304_v19 = vsel %vm924_vm8, %v1186_v55, 0.0  ;;  %v1329_v34 = vmul.f32 %v1186_v55, %v1186_v55 }
 0x1f5   : > { %v1356_v32 = vadd.f32 %v1355_v31, %v1354_v20  ;;  %1278 = vst.msk [vmem:[%s2348_s7 + $0x3c] sm:$0xf] %vm1262_vm9, %v1573_v28  ;;  %v1305_v33 = vadd.f32 %v1304_v19, %v1303_v44  ;;  %v1359_v42 = vsel %vm924_vm8, %v1330_v13, 0.0  ;;  %v1361_v15 = vsel %vm924_vm8, %v1331_v36, 0.0 }
 0x1f6   : > { %1276 = vst.msk [vmem:[%s2348_s7 + $0x34] sm:$0xf] %vm1262_vm9, %v1571_v41  ;;  %v1357_v23 = vsel %vm924_vm8, %v1329_v34, 0.0 }
 0x1f7   : > { %v1307_v37 = vadd.f32 %v1306_v35, %v1305_v33  ;;  %v1358_v40 = vadd.f32 %v1357_v23, %v1356_v32 }
 0x1f9   : > { %v1309_v43 = vadd.f32 %v1308_v38, %v1307_v37  ;;  %v1360_v45 = vadd.f32 %v1359_v42, %v1358_v40 }
 0x1fb   : > { %v1310_v51 = vrot.slane %v1309_v43, 4  ;;  %v1362_v52 = vadd.f32 %v1361_v15, %v1360_v45 }
 0x1fd   : > { %v1311_v53 = vadd.f32 %v1310_v51, %v1309_v43  ;;  %v1363_v54 = vrot.slane %v1362_v52, 4 }
 0x1ff   : > { %v1312_v11 = vrot.slane %v1311_v53, 2  ;;  %v1364_v56 = vadd.f32 %v1363_v54, %v1362_v52 }
 0x201   : > { %v1313_v58 = vadd.f32 %v1312_v11, %v1311_v53  ;;  %v1365_v63 = vrot.slane %v1364_v56, 2 }
 0x203   : > { %v1314_v60 = vrot.slane %v1313_v58, 1  ;;  %v1366_v12 = vadd.f32 %v1365_v63, %v1364_v56 }
 0x205   : > { %v1367_v46 = vrot.slane %v1366_v12, 1  ;;  %v1315_v29 = vadd.f32 %v1314_v60, %v1313_v58 }
 0x207   : > { %v1368_v48 = vadd.f32 %v1367_v46, %v1366_v12 }
 0x209   : > { %v1370_v61 = vsel %vm1369_vm10, %v1315_v29, %v1368_v48 }
 0x20a   : > { %1372 = vst.msk [vmem:[%s308_s14] sm:$0x3] %vm1371_vm11, %v1370_v61 }
 0x20b PF: > { %s17_s25 = sadd.s32 1, %s1730_s25   ;;  %s2449_s21 = smov %s1722_s23 }
 0x20c   : > { %p14_p8 = scmp.ge.s32.totalorder %s17_s25, 6   ;;  %s2450_s22 = smov %s1726_s24 }
 0x20d   : > { %s2451_s23 = smov %s2454_s26  ;;  %s2452_s24 = smov %s2458_s27 }
 0x20e   :  { %16 = sbr.rel (!%p14_p8) target bundleno = 3 (0x3), region = 82 }

</bundles_post_ra>
